<compile_context>
chip_gen: v7x
topology: tpu7x:2x2x1
jax: 0.10.0
libtpu: 0.0.40
codegen_flags: <defaults>
</compile_context>

<pallas_src>
import jax
import jax.numpy as jnp
import numpy as np
from jax import lax
from jax.experimental import pallas as pl
from jax.experimental.pallas import tpu as pltpu

BN_EPS = 1e-5


def _mm_t(x_f32, w_bf16):
    """x: (B, K) f32 activations, w: (N, K) bf16 PyTorch (out, in) layout -> (B, N) f32.
    Activations are cast to bf16 only at the MXU input; accumulation is f32."""
    return lax.dot_general(x_f32.astype(jnp.bfloat16), w_bf16,
                           (((1,), (1,)), ((), ())),
                           preferred_element_type=jnp.float32)


def _bn_train(y, gamma, beta=None):
    """BatchNorm1d with training-mode batch statistics (biased variance), all f32."""
    mean = jnp.mean(y, axis=0, keepdims=True)            # (1, S)
    d = y - mean                                         # reused for var and y_hat
    var = jnp.mean(d * d, axis=0, keepdims=True)         # (1, S)
    out = d * (gamma * lax.rsqrt(var + BN_EPS))          # folded per-feature scale
    if beta is not None:
        out = out + beta
    return out


def skip_forward_net_kernel(x_ref, w1_ref, wblk_ref, w2_ref, b2_ref,
                            gp_ref, bp_ref, gb_ref, bb_ref, o_ref, h_ref):
    i = pl.program_id(0)

    @pl.when(i == 0)
    def _prologue():
        gp = gp_ref[...]                                  # (2, D) gammas for bn0/bn1
        bp = bp_ref[...]                                  # (2, D) betas  for bn0/bn1
        # bn0 on the raw input (beta dropped: cancelled exactly by bn1's mean subtraction)
        h0 = _bn_train(x_ref[...], gp[0:1, :])
        # linear1 (bias cancelled by bn1) -> bn1 -> ReLU
        h_ref[...] = jnp.maximum(
            _bn_train(_mm_t(h0, w1_ref[...]), gp[1:2, :], bp[1:2, :]), 0.0)

    # SkipBlock i: Linear -> BN -> skip add -> ReLU (one block per grid step).
    h = h_ref[...]
    z = _bn_train(_mm_t(h, wblk_ref[0]), gb_ref[0], bb_ref[0])
    h = jnp.maximum(h + z, 0.0)
    h_ref[...] = h

    @pl.when(i == pl.num_programs(0) - 1)
    def _epilogue():
        # linear2 (+ bias) -> ReLU.  Output stays f32 at this toy size so the
        # reference comparison is tight; at scale this store would be bf16.
        o_ref[...] = jnp.maximum(_mm_t(h, w2_ref[...]) + b2_ref[...], 0.0)


def skip_forward_net(x, w1, w_blocks, w2, b2, gammas, betas):
    """x:(B,D_in); w1:(H,D_in), w2:(out,H) PyTorch (out,in); w_blocks:(n_blocks,H,H);
    b2:(1,out); gammas/betas:(2+n_blocks, feature)."""
    B, _ = x.shape
    hidden = w1.shape[0]
    out_dim = w2.shape[0]
    n_blocks = w_blocks.shape[0]
    assert n_blocks >= 1

    # bf16 weight slabs for the MXU (halves weight bytes for DMA/VMEM too).
    w1_b = w1.astype(jnp.bfloat16)
    wblk_b = w_blocks.astype(jnp.bfloat16)
    w2_b = w2.astype(jnp.bfloat16)

    # Split BN params: bn0/bn1 resident; per-block params streamed with the block index.
    gam_pre = gammas[:2]
    bet_pre = betas[:2]
    gam_blk = gammas[2:].reshape(n_blocks, 1, hidden)
    bet_blk = betas[2:].reshape(n_blocks, 1, hidden)

    full = lambda arr: pl.BlockSpec(arr.shape, lambda i, a=arr: (0,) * a.ndim)
    blk3 = lambda shape: pl.BlockSpec(shape, lambda i: (i, 0, 0))

    grid_spec = pltpu.PrefetchScalarGridSpec(
        num_scalar_prefetch=0,
        grid=(n_blocks,),
        in_specs=[
            full(x),                                   # (B, D_in), resident
            full(w1_b),                                # (H, D_in), resident
            blk3((1, hidden, hidden)),                 # one skip-block weight per step
            full(w2_b),                                # (out, H), resident
            full(b2),                                  # (1, out), resident
            full(gam_pre),                             # (2, D) bn0/bn1 gamma
            full(bet_pre),                             # (2, D) bn0/bn1 beta
            blk3((1, 1, hidden)),                      # per-block gamma
            blk3((1, 1, hidden)),                      # per-block beta
        ],
        out_specs=pl.BlockSpec((B, out_dim), lambda i: (0, 0)),   # resident accumulator
        scratch_shapes=[pltpu.VMEM((B, hidden), jnp.float32)],    # persistent h
    )

    return pl.pallas_call(
        skip_forward_net_kernel,
        out_shape=jax.ShapeDtypeStruct((B, out_dim), jnp.float32),
        grid_spec=grid_spec,
        compiler_params=pltpu.CompilerParams(
            dimension_semantics=("arbitrary",),        # h carried across steps
            vmem_limit_bytes=32 * 1024 * 1024,
        ),
    )(x, w1_b, wblk_b, w2_b, b2, gam_pre, bet_pre, gam_blk, bet_blk)


def jax_reference(x, w1, w_blocks, w2, b2, gammas, betas):
    """Pure-JAX (non-Pallas) reference with the same arithmetic (bf16 at the MXU)."""
    def mm(h, w):
        return lax.dot_general(h.astype(jnp.bfloat16), w.astype(jnp.bfloat16),
                               (((1,), (1,)), ((), ())),
                               preferred_element_type=jnp.float32)

    def bn(y, g, be):
        m = jnp.mean(y, axis=0, keepdims=True)
        d = y - m
        v = jnp.mean(d * d, axis=0, keepdims=True)
        return d * (g * lax.rsqrt(v + BN_EPS)) + be

    h = bn(x, gammas[0:1], betas[0:1])
    h = jnp.maximum(bn(mm(h, w1), gammas[1:2], betas[1:2]), 0.0)
    for i in range(w_blocks.shape[0]):
        z = bn(mm(h, w_blocks[i]), gammas[2 + i:3 + i], betas[2 + i:3 + i])
        h = jnp.maximum(h + z, 0.0)
    return jnp.maximum(mm(h, w2) + b2, 0.0)


def numpy_reference_f32(x, w1, w_blocks, w2, b2, gammas, betas):
    """Full-f32 reference of the PyTorch module semantics (loose check only:
    it measures bf16-vs-f32 numerics, not kernel correctness)."""
    def bn(y, g, be):
        m = y.mean(axis=0, keepdims=True)
        v = ((y - m) ** 2).mean(axis=0, keepdims=True)
        return g * (y - m) / np.sqrt(v + BN_EPS) + be

    h = bn(x, gammas[0:1], betas[0:1])
    h = np.maximum(bn(h @ w1.T, gammas[1:2], betas[1:2]), 0.0)
    for i in range(w_blocks.shape[0]):
        z = bn(h @ w_blocks[i].T, gammas[2 + i:3 + i], betas[2 + i:3 + i])
        h = np.maximum(h + z, 0.0)
    return np.maximum(h @ w2.T + b2, 0.0)


if __name__ == "__main__":
    # cfg = [128, 128, 128, 128] -> in_dim=128, hidden=[128,128], out_dim=128.
    # Two SkipBlocks, no transition layers (adjacent hidden sizes are equal).
    B, D = 128, 128
    N_BLOCKS = 2
    N_BN = 2 + N_BLOCKS   # bn0, bn1, one BN per SkipBlock

    key = jax.random.PRNGKey(0)
    kx, k1, kb, k2 = jax.random.split(key, 4)

    x = jax.random.normal(kx, (B, D), dtype=jnp.float32)

    # Xavier-uniform init (init_layer_weights(..., 'xav_uni'); biases zeroed).
    bound = float(np.sqrt(6.0 / (D + D)))
    w1 = jax.random.uniform(k1, (D, D), jnp.float32, -bound, bound)
    w_blocks = jax.random.uniform(kb, (N_BLOCKS, D, D), jnp.float32, -bound, bound)
    w2 = jax.random.uniform(k2, (D, D), jnp.float32, -bound, bound)
    b2 = jnp.zeros((1, D), dtype=jnp.float32)

    # Fresh BatchNorm1d affine params: gamma=1, beta=0.
    gammas = jnp.ones((N_BN, D), dtype=jnp.float32)
    betas = jnp.zeros((N_BN, D), dtype=jnp.float32)

    out = skip_forward_net(x, w1, w_blocks, w2, b2, gammas, betas)
    out = jax.block_until_ready(out)

    # Tight check against a pure-JAX reference with identical (bf16-at-MXU) arithmetic.
    ref = jax.block_until_ready(
        jax_reference(x, w1, w_blocks, w2, b2, gammas, betas))
    np.testing.assert_allclose(np.asarray(out), np.asarray(ref),
                               rtol=5e-3, atol=5e-3)

    # Loose sanity check against the f32 PyTorch-semantics reference
    # (bounds the bf16-vs-f32 numerical drift only).
    ref32 = numpy_reference_f32(np.asarray(x), np.asarray(w1), np.asarray(w_blocks),
                                np.asarray(w2), np.asarray(b2),
                                np.asarray(gammas), np.asarray(betas))
    np.testing.assert_allclose(np.asarray(out), ref32, rtol=0.1, atol=0.1)

    print("KERNEL_OK")
</pallas_src>

<mosaic_0001>
module attributes {stable_mosaic.version = 11 : i64} {
  func.func @skip_forward_net_kernel(%arg0: i32, %arg1: memref<128x128xf32, #tpu.memory_space<vmem>>, %arg2: memref<128x128xbf16, #tpu.memory_space<vmem>>, %arg3: memref<1x128x128xbf16, #tpu.memory_space<vmem>>, %arg4: memref<128x128xbf16, #tpu.memory_space<vmem>>, %arg5: memref<1x128xf32, #tpu.memory_space<vmem>>, %arg6: memref<2x128xf32, #tpu.memory_space<vmem>>, %arg7: memref<2x128xf32, #tpu.memory_space<vmem>>, %arg8: memref<1x1x128xf32, #tpu.memory_space<vmem>>, %arg9: memref<1x1x128xf32, #tpu.memory_space<vmem>>, %arg10: memref<128x128xf32, #tpu.memory_space<vmem>>, %arg11: memref<128x128xf32, #tpu.memory_space<vmem>>) attributes {dimension_semantics = [#tpu.dimension_semantics<arbitrary>], iteration_bounds = array<i64: 2>, scalar_prefetch = 0 : i64, scratch_operands = 1 : i64, tpu.core_type = #tpu.core_type<tc>, window_params = [{pipeline_mode = #tpu.pipeline_mode<synchronous>, transform_indices = @transform_0, window_bounds = array<i64: 128, 128>}, {pipeline_mode = #tpu.pipeline_mode<synchronous>, transform_indices = @transform_1, window_bounds = array<i64: 128, 128>}, {transform_indices = @transform_2, window_bounds = array<i64: 1, 128, 128>}, {pipeline_mode = #tpu.pipeline_mode<synchronous>, transform_indices = @transform_3, window_bounds = array<i64: 128, 128>}, {pipeline_mode = #tpu.pipeline_mode<synchronous>, transform_indices = @transform_4, window_bounds = array<i64: 1, 128>}, {pipeline_mode = #tpu.pipeline_mode<synchronous>, transform_indices = @transform_5, window_bounds = array<i64: 2, 128>}, {pipeline_mode = #tpu.pipeline_mode<synchronous>, transform_indices = @transform_6, window_bounds = array<i64: 2, 128>}, {transform_indices = @transform_7, window_bounds = array<i64: 1, 1, 128>}, {transform_indices = @transform_8, window_bounds = array<i64: 1, 1, 128>}, {pipeline_mode = #tpu.pipeline_mode<synchronous>, transform_indices = @transform_9, window_bounds = array<i64: 128, 128>}]} {
    %c0_i32 = arith.constant 0 : i32
    %0 = arith.cmpi eq, %arg0, %c0_i32 : i32
    %1 = arith.extui %0 : i1 to i32
    %c0_i32_0 = arith.constant 0 : i32
    %2 = arith.cmpi ne, %1, %c0_i32_0 : i32
    scf.if %2 {
      %c0_20 = arith.constant 0 : index
      %c0_21 = arith.constant 0 : index
      %38 = vector.load %arg6[%c0_20, %c0_21] : memref<2x128xf32, #tpu.memory_space<vmem>>, vector<2x128xf32>
      %c0_22 = arith.constant 0 : index
      %c0_23 = arith.constant 0 : index
      %39 = vector.load %arg7[%c0_22, %c0_23] : memref<2x128xf32, #tpu.memory_space<vmem>>, vector<2x128xf32>
      %c0_24 = arith.constant 0 : index
      %c0_25 = arith.constant 0 : index
      %40 = vector.load %arg1[%c0_24, %c0_25] : memref<128x128xf32, #tpu.memory_space<vmem>>, vector<128x128xf32>
      %41 = vector.extract_strided_slice %38 {offsets = [0, 0], sizes = [1, 128], strides = [1, 1]} : vector<2x128xf32> to vector<1x128xf32>
      %cst_26 = arith.constant dense<0.000000e+00> : vector<128xf32>
      %42 = vector.multi_reduction <add>, %40, %cst_26 [0] : vector<128x128xf32> to vector<128xf32>
      %43 = vector.shape_cast %42 : vector<128xf32> to vector<1x128xf32>
      %cst_27 = arith.constant 1.280000e+02 : f32
      %44 = vector.broadcast %cst_27 : f32 to vector<1x128xf32>
      %45 = arith.divf %43, %44 : vector<1x128xf32>
      %46 = vector.broadcast %45 : vector<1x128xf32> to vector<128x128xf32>
      %47 = arith.subf %40, %46 : vector<128x128xf32>
      %48 = arith.mulf %47, %47 : vector<128x128xf32>
      %cst_28 = arith.constant dense<0.000000e+00> : vector<128xf32>
      %49 = vector.multi_reduction <add>, %48, %cst_28 [0] : vector<128x128xf32> to vector<128xf32>
      %50 = vector.shape_cast %49 : vector<128xf32> to vector<1x128xf32>
      %cst_29 = arith.constant 1.280000e+02 : f32
      %51 = vector.broadcast %cst_29 : f32 to vector<1x128xf32>
      %52 = arith.divf %50, %51 : vector<1x128xf32>
      %cst_30 = arith.constant 9.99999974E-6 : f32
      %53 = vector.broadcast %cst_30 : f32 to vector<1x128xf32>
      %54 = arith.addf %52, %53 : vector<1x128xf32>
      %55 = math.rsqrt %54 : vector<1x128xf32>
      %56 = arith.mulf %41, %55 : vector<1x128xf32>
      %57 = vector.broadcast %56 : vector<1x128xf32> to vector<128x128xf32>
      %58 = arith.mulf %47, %57 : vector<128x128xf32>
      %c0_31 = arith.constant 0 : index
      %c0_32 = arith.constant 0 : index
      %59 = vector.load %arg2[%c0_31, %c0_32] : memref<128x128xbf16, #tpu.memory_space<vmem>>, vector<128x128xbf16>
      %60 = arith.truncf %58 : vector<128x128xf32> to vector<128x128xbf16>
      %cst_33 = arith.constant dense<0.000000e+00> : vector<128x128xf32>
      %61 = tpu.matmul %60, %59, %cst_33 {dimension_numbers = #tpu.dot_dimension_numbers<[1], [1], [0], [0], [0, 0, 1, 0], [], []>} : vector<128x128xbf16>, vector<128x128xbf16>, vector<128x128xf32> -> vector<128x128xf32>
      %62 = vector.extract_strided_slice %38 {offsets = [1, 0], sizes = [1, 128], strides = [1, 1]} : vector<2x128xf32> to vector<1x128xf32>
      %63 = vector.extract_strided_slice %39 {offsets = [1, 0], sizes = [1, 128], strides = [1, 1]} : vector<2x128xf32> to vector<1x128xf32>
      %cst_34 = arith.constant dense<0.000000e+00> : vector<128xf32>
      %64 = vector.multi_reduction <add>, %61, %cst_34 [0] : vector<128x128xf32> to vector<128xf32>
      %65 = vector.shape_cast %64 : vector<128xf32> to vector<1x128xf32>
      %cst_35 = arith.constant 1.280000e+02 : f32
      %66 = vector.broadcast %cst_35 : f32 to vector<1x128xf32>
      %67 = arith.divf %65, %66 : vector<1x128xf32>
      %68 = vector.broadcast %67 : vector<1x128xf32> to vector<128x128xf32>
      %69 = arith.subf %61, %68 : vector<128x128xf32>
      %70 = arith.mulf %69, %69 : vector<128x128xf32>
      %cst_36 = arith.constant dense<0.000000e+00> : vector<128xf32>
      %71 = vector.multi_reduction <add>, %70, %cst_36 [0] : vector<128x128xf32> to vector<128xf32>
      %72 = vector.shape_cast %71 : vector<128xf32> to vector<1x128xf32>
      %cst_37 = arith.constant 1.280000e+02 : f32
      %73 = vector.broadcast %cst_37 : f32 to vector<1x128xf32>
      %74 = arith.divf %72, %73 : vector<1x128xf32>
      %cst_38 = arith.constant 9.99999974E-6 : f32
      %75 = vector.broadcast %cst_38 : f32 to vector<1x128xf32>
      %76 = arith.addf %74, %75 : vector<1x128xf32>
      %77 = math.rsqrt %76 : vector<1x128xf32>
      %78 = arith.mulf %62, %77 : vector<1x128xf32>
      %79 = vector.broadcast %78 : vector<1x128xf32> to vector<128x128xf32>
      %80 = arith.mulf %69, %79 : vector<128x128xf32>
      %81 = vector.broadcast %63 : vector<1x128xf32> to vector<128x128xf32>
      %82 = arith.addf %80, %81 : vector<128x128xf32>
      %cst_39 = arith.constant 0.000000e+00 : f32
      %83 = vector.broadcast %cst_39 : f32 to vector<128x128xf32>
      %84 = arith.maximumf %82, %83 : vector<128x128xf32>
      %c0_40 = arith.constant 0 : index
      %c0_41 = arith.constant 0 : index
      %85 = vector.load %arg11[%c0_40, %c0_41] : memref<128x128xf32, #tpu.memory_space<vmem>>, vector<128x128xf32>
      tpu.vector_store %arg11[%c0_40, %c0_41], %84 {strides = array<i32>} : memref<128x128xf32, #tpu.memory_space<vmem>>, vector<128x128xf32>,
    } else {
    }
    %c0 = arith.constant 0 : index
    %c0_1 = arith.constant 0 : index
    %3 = vector.load %arg11[%c0, %c0_1] : memref<128x128xf32, #tpu.memory_space<vmem>>, vector<128x128xf32>
    %c0_2 = arith.constant 0 : index
    %c0_3 = arith.constant 0 : index
    %c0_4 = arith.constant 0 : index
    %4 = vector.load %arg3[%c0_2, %c0_3, %c0_4] : memref<1x128x128xbf16, #tpu.memory_space<vmem>>, vector<1x128x128xbf16>
    %5 = vector.shape_cast %4 : vector<1x128x128xbf16> to vector<128x128xbf16>
    %6 = arith.truncf %3 : vector<128x128xf32> to vector<128x128xbf16>
    %cst = arith.constant dense<0.000000e+00> : vector<128x128xf32>
    %7 = tpu.matmul %6, %5, %cst {dimension_numbers = #tpu.dot_dimension_numbers<[1], [1], [0], [0], [0, 0, 1, 0], [], []>} : vector<128x128xbf16>, vector<128x128xbf16>, vector<128x128xf32> -> vector<128x128xf32>
    %c0_5 = arith.constant 0 : index
    %c0_6 = arith.constant 0 : index
    %c0_7 = arith.constant 0 : index
    %8 = vector.load %arg8[%c0_5, %c0_6, %c0_7] : memref<1x1x128xf32, #tpu.memory_space<vmem>>, vector<1x1x128xf32>
    %9 = vector.shape_cast %8 : vector<1x1x128xf32> to vector<1x128xf32>
    %c0_8 = arith.constant 0 : index
    %c0_9 = arith.constant 0 : index
    %c0_10 = arith.constant 0 : index
    %10 = vector.load %arg9[%c0_8, %c0_9, %c0_10] : memref<1x1x128xf32, #tpu.memory_space<vmem>>, vector<1x1x128xf32>
    %11 = vector.shape_cast %10 : vector<1x1x128xf32> to vector<1x128xf32>
    %cst_11 = arith.constant dense<0.000000e+00> : vector<128xf32>
    %12 = vector.multi_reduction <add>, %7, %cst_11 [0] : vector<128x128xf32> to vector<128xf32>
    %13 = vector.shape_cast %12 : vector<128xf32> to vector<1x128xf32>
    %cst_12 = arith.constant 1.280000e+02 : f32
    %14 = vector.broadcast %cst_12 : f32 to vector<1x128xf32>
    %15 = arith.divf %13, %14 : vector<1x128xf32>
    %16 = vector.broadcast %15 : vector<1x128xf32> to vector<128x128xf32>
    %17 = arith.subf %7, %16 : vector<128x128xf32>
    %18 = arith.mulf %17, %17 : vector<128x128xf32>
    %cst_13 = arith.constant dense<0.000000e+00> : vector<128xf32>
    %19 = vector.multi_reduction <add>, %18, %cst_13 [0] : vector<128x128xf32> to vector<128xf32>
    %20 = vector.shape_cast %19 : vector<128xf32> to vector<1x128xf32>
    %cst_14 = arith.constant 1.280000e+02 : f32
    %21 = vector.broadcast %cst_14 : f32 to vector<1x128xf32>
    %22 = arith.divf %20, %21 : vector<1x128xf32>
    %cst_15 = arith.constant 9.99999974E-6 : f32
    %23 = vector.broadcast %cst_15 : f32 to vector<1x128xf32>
    %24 = arith.addf %22, %23 : vector<1x128xf32>
    %25 = math.rsqrt %24 : vector<1x128xf32>
    %26 = arith.mulf %9, %25 : vector<1x128xf32>
    %27 = vector.broadcast %26 : vector<1x128xf32> to vector<128x128xf32>
    %28 = arith.mulf %17, %27 : vector<128x128xf32>
    %29 = vector.broadcast %11 : vector<1x128xf32> to vector<128x128xf32>
    %30 = arith.addf %28, %29 : vector<128x128xf32>
    %31 = arith.addf %3, %30 : vector<128x128xf32>
    %cst_16 = arith.constant 0.000000e+00 : f32
    %32 = vector.broadcast %cst_16 : f32 to vector<128x128xf32>
    %33 = arith.maximumf %31, %32 : vector<128x128xf32>
    %c0_17 = arith.constant 0 : index
    %c0_18 = arith.constant 0 : index
    %34 = vector.load %arg11[%c0_17, %c0_18] : memref<128x128xf32, #tpu.memory_space<vmem>>, vector<128x128xf32>
    tpu.vector_store %arg11[%c0_17, %c0_18], %33 {strides = array<i32>} : memref<128x128xf32, #tpu.memory_space<vmem>>, vector<128x128xf32>,
    %c1_i32 = arith.constant 1 : i32
    %35 = arith.cmpi eq, %arg0, %c1_i32 : i32
    %36 = arith.extui %35 : i1 to i32
    %c0_i32_19 = arith.constant 0 : i32
    %37 = arith.cmpi ne, %36, %c0_i32_19 : i32
    scf.if %37 {
      %c0_20 = arith.constant 0 : index
      %c0_21 = arith.constant 0 : index
      %38 = vector.load %arg4[%c0_20, %c0_21] : memref<128x128xbf16, #tpu.memory_space<vmem>>, vector<128x128xbf16>
      %39 = arith.truncf %33 : vector<128x128xf32> to vector<128x128xbf16>
      %cst_22 = arith.constant dense<0.000000e+00> : vector<128x128xf32>
      %40 = tpu.matmul %39, %38, %cst_22 {dimension_numbers = #tpu.dot_dimension_numbers<[1], [1], [0], [0], [0, 0, 1, 0], [], []>} : vector<128x128xbf16>, vector<128x128xbf16>, vector<128x128xf32> -> vector<128x128xf32>
      %c0_23 = arith.constant 0 : index
      %c0_24 = arith.constant 0 : index
      %41 = vector.load %arg5[%c0_23, %c0_24] : memref<1x128xf32, #tpu.memory_space<vmem>>, vector<1x128xf32>
      %42 = vector.broadcast %41 : vector<1x128xf32> to vector<128x128xf32>
      %43 = arith.addf %40, %42 : vector<128x128xf32>
      %cst_25 = arith.constant 0.000000e+00 : f32
      %44 = vector.broadcast %cst_25 : f32 to vector<128x128xf32>
      %45 = arith.maximumf %43, %44 : vector<128x128xf32>
      %c0_26 = arith.constant 0 : index
      %c0_27 = arith.constant 0 : index
      %46 = vector.load %arg10[%c0_26, %c0_27] : memref<128x128xf32, #tpu.memory_space<vmem>>, vector<128x128xf32>
      tpu.vector_store %arg10[%c0_26, %c0_27], %45 {strides = array<i32>} : memref<128x128xf32, #tpu.memory_space<vmem>>, vector<128x128xf32>,
    } else {
    }
    return
  }
  func.func @transform_0(%arg0: i32) -> (i32, i32) {
    %c0_i32 = arith.constant 0 : i32
    %c0_i32_0 = arith.constant 0 : i32
    %c0_i32_1 = arith.constant 0 : i32
    return %c0_i32, %c0_i32_0 : i32, i32
  }
  func.func @transform_1(%arg0: i32) -> (i32, i32) {
    %c0_i32 = arith.constant 0 : i32
    %c0_i32_0 = arith.constant 0 : i32
    %c0_i32_1 = arith.constant 0 : i32
    return %c0_i32, %c0_i32_0 : i32, i32
  }
  func.func @transform_2(%arg0: i32) -> (i32, i32, i32) {
    %c0_i32 = arith.constant 0 : i32
    %c0_i32_0 = arith.constant 0 : i32
    %c0_i32_1 = arith.constant 0 : i32
    return %arg0, %c0_i32, %c0_i32_0 : i32, i32, i32
  }
  func.func @transform_3(%arg0: i32) -> (i32, i32) {
    %c0_i32 = arith.constant 0 : i32
    %c0_i32_0 = arith.constant 0 : i32
    %c0_i32_1 = arith.constant 0 : i32
    return %c0_i32, %c0_i32_0 : i32, i32
  }
  func.func @transform_4(%arg0: i32) -> (i32, i32) {
    %c0_i32 = arith.constant 0 : i32
    %c0_i32_0 = arith.constant 0 : i32
    %c0_i32_1 = arith.constant 0 : i32
    return %c0_i32, %c0_i32_0 : i32, i32
  }
  func.func @transform_5(%arg0: i32) -> (i32, i32) {
    %c0_i32 = arith.constant 0 : i32
    %c0_i32_0 = arith.constant 0 : i32
    %c0_i32_1 = arith.constant 0 : i32
    return %c0_i32, %c0_i32_0 : i32, i32
  }
  func.func @transform_6(%arg0: i32) -> (i32, i32) {
    %c0_i32 = arith.constant 0 : i32
    %c0_i32_0 = arith.constant 0 : i32
    %c0_i32_1 = arith.constant 0 : i32
    return %c0_i32, %c0_i32_0 : i32, i32
  }
  func.func @transform_7(%arg0: i32) -> (i32, i32, i32) {
    %c0_i32 = arith.constant 0 : i32
    %c0_i32_0 = arith.constant 0 : i32
    %c0_i32_1 = arith.constant 0 : i32
    return %arg0, %c0_i32, %c0_i32_0 : i32, i32, i32
  }
  func.func @transform_8(%arg0: i32) -> (i32, i32, i32) {
    %c0_i32 = arith.constant 0 : i32
    %c0_i32_0 = arith.constant 0 : i32
    %c0_i32_1 = arith.constant 0 : i32
    return %arg0, %c0_i32, %c0_i32_0 : i32, i32, i32
  }
  func.func @transform_9(%arg0: i32) -> (i32, i32) {
    %c0_i32 = arith.constant 0 : i32
    %c0_i32_0 = arith.constant 0 : i32
    %c0_i32_1 = arith.constant 0 : i32
    return %c0_i32, %c0_i32_0 : i32, i32
  }
}

</mosaic_0001>

<bundles_post_ra>
// kernel: tpu_custom_call.1
= control target key start
LH: loop header
LB: loop body
LE: loop exit
PB: predicated region body
PF: predicated region fallthrough
CT: control target
= control target key end

     0   :  { %s2732_s0 = inlined_call_operand.hbm [shape: f32[128,128], index: 0, kind: input, shape index: {}]   ;;  %s2733_s1 = inlined_call_operand.hbm [shape: bf16[128,128], index: 1, kind: input, shape index: {}]   ;;  %s2734_s2 = inlined_call_operand.hbm [shape: bf16[2,128,128], index: 2, kind: input, shape index: {}]   ;;  %s2735_s3 = inlined_call_operand.hbm [shape: bf16[128,128], index: 3, kind: input, shape index: {}]   ;;  %s2736_s4 = inlined_call_operand.vmem [shape: f32[1,128], index: 4, kind: input, shape index: {}]   ;;  %s2737_s5 = inlined_call_operand.vmem [shape: f32[2,128], index: 5, kind: input, shape index: {}]   ;;  %s2738_s6 = inlined_call_operand.vmem [shape: f32[2,128], index: 6, kind: input, shape index: {}]   ;;  %s2739_s7 = inlined_call_operand.vmem [shape: f32[2,1,128], index: 7, kind: input, shape index: {}]   ;;  %s2740_s8 = inlined_call_operand.vmem [shape: f32[2,1,128], index: 8, kind: input, shape index: {}]   ;;  %s2741_s9 = inlined_call_operand.hbm [shape: f32[128,128], index: 9, kind: output, shape index: {}]  }
   0x1   :  { %2749 = sst [smem:[#allocation18_spill]] %s2732_s0 }
   0x2   :  { %2750 = sst [smem:[#allocation19_spill]] %s2736_s4 }
   0x3   :  { %2751 = sst [smem:[#allocation20_spill]] %s2738_s6 }
   0x4   :  { %2752 = sst [smem:[#allocation21_spill]] %s2741_s9 }
   0x5   :  { %14 = vsyncpa [#allocation4], 0 }
   0x6   :  { %15 = vsyncpa [#allocation7], 0 }
   0x7   :  { %16 = vsyncpa [#allocation5], 0  ;;  %s2132_s30 = smov 0   ;;  %s2134_s10 = smov 0  }
   0x8   :  { %s2136_s11 = smov 0   ;;  %s2138_s12 = smov 0  }
   0x9 LB: > { %s2151_s13 = sadd.s32 4294967295, %s2069_s12   ;;  %s2154_s14 = sadd.s32 1, %s2069_s12   ;;  %s2069_s12 = sphi %s2138_s12, %s2775_s12   ;;  %s2065_s11 = sphi %s2136_s11, %s2779_s11   ;;  %s2061_s10 = sphi %s2134_s10, %s2778_s10   ;;  %s2057_s30 = sphi %s2132_s30, %s2777_s30  }
   0xa   : > { %2753 = sst [smem:[#allocation16_spill]] %s2154_s14  ;;  %s68_s15 = ssub.s32 %s2069_s12, %s2154_s14 }
   0xb   : > { %s71_s16 = sadd.s32 1, %s2065_s11  ;;  %p69_p0 = scmp.eq.s32.totalorder %s68_s15, 0 }
   0xc   : > { %p78_p1 = scmp.ne.s32.totalorder %s2065_s11, %s2061_s10  ;;  %p79_p2 = scmp.eq.s32.totalorder %s2069_s12, 0 }
   0xd   : > { %p84_p3 = scmp.ne.s32.totalorder %s2061_s10, %s2057_s30  ;;  %p2742_p5 = scmp.eq.s32.totalorder %s2151_s13, 0 }
   0xe   : > { %s2164_s17 = scalar_select %p69_p0, %s2065_s11, %s71_s16  }
   0xf   : > { %p2166_p4 = por %p79_p2, %p78_p1  ;;  %p1528_p6 = scmp.ge.s32.totalorder %s2069_s12, 1 }
  0x10   : > { %2754 = sst [smem:[#allocation17_spill]] %s2164_s17  ;;  %p252_p7 = scmp.lt.s32.totalorder %s2069_s12, 3 }
  0x11   : > { %p2175_p8 = por %p2742_p5, %p84_p3  ;;  %s2071_s21 = smov [#allocation3]  }
  0x12   : > { %p2180_p10 = pnand %p1528_p6, %p252_p7  ;;  %s264_s22 = sshll.u32 %s2071_s21, 4  ;;  %s265_s22 = int_to_ptr.vmem [resolvable:$true] %s264_s22 }
  0x13   : > { %s2756_s19 = scalar_select %p2175_p8, 1, 0 }
  0x14   : > { %s2757_s20 = scalar_select %p2180_p10, 1, 0 }
  0x15   : > { %p1784_p11 = pneg %p2180_p10  ;;  %p1801_p13 = scmp.lt.s32.totalorder %s2069_s12, 2 }
  0x16   : > { %s2760_s0 = sld [smem:[#allocation18_spill]] }
  0x17   : > { %p2188_p12 = pnand %p1784_p11, %p2742_p5  ;;  %p2195_p0 = pnand %p1801_p13, %p2166_p4 }
  0x19   : > { %s2759_s24 = scalar_select %p2195_p0, 1, 0 }
  0x1a   : > { %p2207_p2 = pneg %p2188_p12 }
  0x1c   : > { %s1879_s27 = scalar_lea.hbm %s2760_s0, 2048 }
  0x1d   : > { %p1880_p1 = scmp.ne.s32.totalorder %s2760_s0, %s1879_s27  ;;  %p1886_p6 = scmp.lt.u32.totalorder %s1879_s27, %s2760_s0 }
  0x1f   : > { %p1882_p3 = pnand %p2207_p2, %p1880_p1 }
  0x21   : > { %p1883_p4 = pneg %p1882_p3 }
  0x23   : > { %p1888_p7 = pnand %p1886_p6, %p1883_p4 }
  0x25   : > { %1891 = shalt.err (!%p1888_p7)
}
  0x26   : > { %s1892_s18 = scalar_lea.vmem %s265_s22, 2048  ;;  %p1900_p5 = scmp.lt.s32.totalorder %s265_s22, %s265_s22 }
  0x27   : > { %p1893_p11 = scmp.ne.s32.totalorder %s265_s22, %s1892_s18  ;;  %p1901_p8 = scmp.lt.s32.totalorder %s1892_s18, %s1892_s18 }
  0x29   : > { %p1895_p13 = pnand %p1893_p11, %p2207_p2  ;;  %p1902_p10 = por %p1901_p8, %p1900_p5 }
  0x2b   : > { %p1896_p9 = pneg %p1895_p13 }
  0x2d   : > { %p1903_p0 = pnand %p1902_p10, %p1896_p9 }
  0x2f   : > { %1906 = shalt.err (!%p1903_p0)
}
  0x30   : > { %s2072_s21 = smov 128   ;;  %s2073_s25 = smov 8  }
  0x31   : > { %1787 = dma.hbm_to_vmem [thread:$0]  (!%p2188_p12), %s2760_s0, 2048, %s265_s22, [#allocation4], %s2072_s21, %s2072_s21, %s2073_s25  }
  0x32   : > { %s2074_s28 = smov [#allocation6]   ;;  %s1907_s17 = scalar_lea.hbm %s2733_s1, 1024 }
  0x33   : > { %s277_s29 = sshll.u32 %s2074_s28, 4  ;;  %p1908_p5 = scmp.ne.s32.totalorder %s2733_s1, %s1907_s17  ;;  %s278_s29 = int_to_ptr.vmem [resolvable:$true] %s277_s29 }
  0x34   : > { %p1914_p10 = scmp.lt.u32.totalorder %s1907_s17, %s2733_s1 }
  0x35   : > { %p1910_p8 = pnand %p1908_p5, %p2207_p2 }
  0x37   : > { %p1911_p9 = pneg %p1910_p8 }
  0x39   : > { %p1916_p0 = pnand %p1914_p10, %p1911_p9 }
  0x3b   : > { %1919 = shalt.err (!%p1916_p0)
}
  0x3c   : > { %s1920_s22 = scalar_lea.vmem %s278_s29, 1024  ;;  %p1928_p6 = scmp.lt.s32.totalorder %s278_s29, %s278_s29 }
  0x3d   : > { %p1921_p1 = scmp.ne.s32.totalorder %s278_s29, %s1920_s22  ;;  %p1929_p7 = scmp.lt.s32.totalorder %s1920_s22, %s1920_s22 }
  0x3f   : > { %p1923_p3 = pnand %p1921_p1, %p2207_p2  ;;  %p1930_p11 = por %p1929_p7, %p1928_p6 }
  0x41   : > { %p1924_p4 = pneg %p1923_p3 }
  0x43   : > { %p1931_p13 = pnand %p1930_p11, %p1924_p4 }
  0x45   : > { %1934 = shalt.err (!%p1931_p13)
}
  0x46   : > { %s2075_s14 = smov 64   ;;  %s2076_s4 = smov 4  }
  0x47   : > { %1790 = dma.hbm_to_vmem [thread:$0]  (!%p2188_p12), %s2733_s1, 1024, %s278_s29, [#allocation7], %s2075_s14, %s2075_s14, %s2076_s4  }
  0x48   : > { %s313_s21 = sand.u32 1, %s2069_s12   ;;  %s2077_s25 = smov [#allocation9]  }
  0x49   : > { %s290_s26 = sshll.u32 %s2077_s25, 4  ;;  %s315_s27 = sand.u32 1, %s2065_s11   ;;  %s291_s26 = int_to_ptr.vmem [resolvable:$true] %s290_s26 }
  0x4a   : > { %s1935_s16 = scalar_lea.hbm %s2735_s3, 1024 }
  0x4b   : > { %p1936_p5 = scmp.ne.s32.totalorder %s2735_s3, %s1935_s16  ;;  %p1942_p10 = scmp.lt.u32.totalorder %s1935_s16, %s2735_s3 }
  0x4d   : > { %p1938_p8 = pnand %p1936_p5, %p2207_p2 }
  0x4f   : > { %p1939_p9 = pneg %p1938_p8 }
  0x51   : > { %p1944_p0 = pnand %p1942_p10, %p1939_p9 }
  0x53   : > { %1947 = shalt.err (!%p1944_p0)
}
  0x54   : > { %s1948_s29 = scalar_lea.vmem %s291_s26, 1024  ;;  %p1956_p6 = scmp.lt.s32.totalorder %s291_s26, %s291_s26 }
  0x55   : > { %p1949_p1 = scmp.ne.s32.totalorder %s291_s26, %s1948_s29  ;;  %p1957_p7 = scmp.lt.s32.totalorder %s1948_s29, %s1948_s29 }
  0x57   : > { %p1951_p3 = pnand %p1949_p1, %p2207_p2  ;;  %p1958_p11 = por %p1957_p7, %p1956_p6 }
  0x59   : > { %p1952_p4 = pneg %p1951_p3 }
  0x5b   : > { %p1959_p13 = pnand %p1958_p11, %p1952_p4 }
  0x5d   : > { %1962 = shalt.err (!%p1959_p13)
}
  0x5e   : > { %1793 = dma.hbm_to_vmem [thread:$0]  (!%p2188_p12), %s2735_s3, 1024, %s291_s26, [#allocation7], %s2075_s14, %s2075_s14, %s2076_s4  }
  0x5f   : > { %s1533_s30 = sshll.u32 %s315_s27, 6  ;;  %s1573_s9 = sshll.u32 %s2069_s12, 10 }
  0x60   : > { %s2271_s28 = scalar_lea.hbm %s2734_s2, %s1573_s9  ;;  %s317_s23 = scalar_lea.vmem [#allocation8], %s1533_s30 }
  0x61   : > { %s324_s15 = sshll.u32 %s317_s23, 4  ;;  %s2275_s16 = scalar_lea.sflag [#allocation4], %s313_s21  ;;  %s2273_s15 = int_to_ptr.vmem [resolvable:$true] %s324_s15 }
  0x62   : > { %s1963_s18 = scalar_lea.hbm %s2271_s28, 1024  ;;  %p2762_p12 = scmp.ne.s32.totalorder %s2759_s24, 0 }
  0x63   : > { %p1964_p2 = scmp.ne.s32.totalorder %s2271_s28, %s1963_s18  ;;  %s1968_s27 = scalar_lea.hbm %s2734_s2, 2048 }
  0x64   : > { %p1965_p5 = pneg %p2762_p12  ;;  %p1969_p10 = scmp.lt.u32.totalorder %s2271_s28, %s2734_s2 }
  0x65   : > { %p1970_p0 = scmp.lt.u32.totalorder %s1968_s27, %s1963_s18  ;;  %p1972_p3 = scmp.lt.u32.totalorder %s1963_s18, %s2271_s28 }
  0x66   : > { %p1966_p8 = pnand %p1965_p5, %p1964_p2 }
  0x67   : > { %p1971_p1 = por %p1970_p0, %p1969_p10 }
  0x68   : > { %p1967_p9 = pneg %p1966_p8 }
  0x69   : > { %p1973_p4 = por %p1972_p3, %p1971_p1 }
  0x6b   : > { %p1974_p6 = pnand %p1973_p4, %p1967_p9 }
  0x6d   : > { %1977 = shalt.err (!%p1974_p6)
}
  0x6e   : > { %s1978_s21 = scalar_lea.vmem %s2273_s15, 1024  ;;  %s2078_s0 = smov [#allocation8]  }
  0x6f   : > { %p1979_p7 = scmp.ne.s32.totalorder %s2273_s15, %s1978_s21  ;;  %s1983_s6 = sshll.u32 %s2078_s0, 4  ;;  %s1984_s6 = int_to_ptr.vmem [resolvable:$false] %s1983_s6 }
  0x70   : > { %s1985_s30 = scalar_lea.vmem %s1984_s6, 2048  ;;  %p1986_p2 = scmp.lt.s32.totalorder %s2273_s15, %s1984_s6 }
  0x71   : > { %p1981_p11 = pnand %p1979_p7, %p1965_p5  ;;  %p1987_p8 = scmp.lt.s32.totalorder %s1985_s30, %s1978_s21 }
  0x73   : > { %p1982_p13 = pneg %p1981_p11  ;;  %p1988_p10 = por %p1987_p8, %p1986_p2 }
  0x75   : > { %p1989_p0 = pnand %p1988_p10, %p1982_p13 }
  0x77   : > { %1992 = shalt.err (!%p1989_p0)
}
  0x78   : > { %1797 = dma.hbm_to_vmem [thread:$0]  (!%p2762_p12), %s2271_s28, 1024, %s2273_s15, %s2275_s16, %s2075_s14, %s2075_s14, %s2076_s4  }
  0x79   : > { %p2763_p5 = scmp.ne.s32.totalorder %s2757_s20, 0 }
  0x7a   : > { %p2764_p9 = scmp.eq.s32.totalorder (!%p2763_p5), %s2151_s13, 0 }
  0x7b   : > { %348 = sbr.rel (%p2763_p5) target bundleno = 1327 (0x52f), region = 56 }
  0x82   : > { %2036 = dma.done.wait (%p2764_p9), [#allocation4], 2048   ;;  %p2765_p1 = pmov %p2764_p9 }
  0x84   : > { %2038 = vsyncadd (%p2765_p1), [#allocation4], 4294965248  ;;  %p2766_p3 = pmov %p2765_p1 }
  0x85   : > { %p2767_p4 = pmov %p2765_p1 }
  0x86   : > { %2040 = dma.done.wait (%p2766_p3), [#allocation7], 1024  }
  0x87   : > { %2042 = vsyncadd (%p2767_p4), [#allocation7], 4294966272  ;;  %s358_s24 = sand.u32 1, %s2151_s13   ;;  %s360_s14 = sand.u32 1, %s2061_s10  }
  0x88   : > { %s1539_s4 = sshll.u32 %s360_s14, 6  ;;  %s359_s20 = scalar_lea.sflag [#allocation4], %s358_s24 }
  0x89   : > { %s2318_s9 = scalar_lea.vmem [#allocation8], %s1539_s4  ;;  %p2768_p12 = scmp.ne.s32.totalorder %s2756_s19, 0 }
  0x8b   : > { %2044 = dma.done.wait (%p2768_p12), %s359_s20, 1024  }
  0x8c   : > { %2046 = vsyncadd (%p2768_p12), %s359_s20, 4294966272  ;;  %p2769_p6 = pmov %p2765_p1 }
  0x8d   : > { %p2770_p7 = pmov %p2765_p1 }
  0x8e   : > { %2048 = dma.done.wait (%p2769_p6), [#allocation7], 1024  }
  0x8f   : > { %2050 = vsyncadd (%p2770_p7), [#allocation7], 4294966272  ;;  %p402_p11 = scmp.lt.s32.totalorder %s2151_s13, 1  ;;  %p2771_p13 = scmp.ne.s32.totalorder %s2151_s13, 0 }
  0x90   : > { %v1849_v0 = vld [vmem:[#allocation6] sm:$0xff] (!%p2771_p13)   ;;  %v1850_v1 = vld [vmem:[#allocation6 + $0x8] sm:$0xff] (!%p2771_p13)   ;;  %v1851_v2 = vld [vmem:[#allocation6 + $0x10] sm:$0xff] (!%p2771_p13)   ;;  %s2772_s22 = sld [smem:[#allocation20_spill]] (!%p2771_p13) }
  0x91   : > { %s2330_s17 = scalar_select %p402_p11, %s2151_s13, 1 }
  0x92   : > { %412 = sbr.rel (%p2771_p13) target bundleno = 605 (0x25d), region = 76  ;;  %1622 = vmatprep.subr.bf16.mxu0 (!%p2771_p13), %v1849_v0  ;;  %1718 = vmatprep.subr.bf16.mxu1 (!%p2771_p13), %v1849_v0  ;;  %v2342_v3 = vld [vmem:[#allocation3] sm:$0xff] (!%p2771_p13)  ;;  %v2344_v4 = vld [vmem:[#allocation3 + $0x8] sm:$0xff] (!%p2771_p13)  ;;  %v2346_v5 = vld [vmem:[#allocation3 + $0x10] sm:$0xff] (!%p2771_p13) }
  0x93   : > { %s404_s23 = scalar_lea.vmem %s2739_s7, %s2330_s17  ;;  %s407_s16 = scalar_lea.vmem %s2740_s8, %s2330_s17  ;;  %1623 = vmatpush3.bf16.xpose.msra.mxu0 (!%p2771_p13), %v1849_v0  ;;  %1726 = vmatpush3.bf16.xpose.msra.mxu1 (!%p2771_p13), %v1849_v0  ;;  %v431_v6 = vadd.f32 (!%p2771_p13), %v2344_v4, %v2342_v3  ;;  %v2350_v7 = vld [vmem:[#allocation3 + $0x18] sm:$0xff] (!%p2771_p13)  ;;  %v2353_v9 = vld [vmem:[#allocation3 + $0x20] sm:$0xff] (!%p2771_p13)  ;;  %v2356_v11 = vld [vmem:[#allocation3 + $0x28] sm:$0xff] (!%p2771_p13) }
  0x94   : > { %1624 = vmatprep.subr.bf16.mxu0 (!%p2771_p13), %v1850_v1  ;;  %1719 = vmatprep.subr.bf16.mxu1 (!%p2771_p13), %v1850_v1  ;;  %v1852_v13 = vld [vmem:[#allocation6 + $0x18] sm:$0xff] (!%p2771_p13)   ;;  %v2359_v14 = vld [vmem:[#allocation3 + $0x30] sm:$0xff] (!%p2771_p13)  ;;  %v2365_v18 = vld [vmem:[#allocation3 + $0x40] sm:$0xff] (!%p2771_p13) }
  0x95   : > { %v432_v8 = vadd.f32 (!%p2771_p13), %v431_v6, %v2346_v5  ;;  %v2362_v16 = vld [vmem:[#allocation3 + $0x38] sm:$0xff] (!%p2771_p13)  ;;  %v2368_v20 = vld [vmem:[#allocation3 + $0x48] sm:$0xff] (!%p2771_p13)  ;;  %v1853_v22 = vld [vmem:[#allocation6 + $0x20] sm:$0xff] (!%p2771_p13)  }
  0x96   : > { %v2371_v23 = vld [vmem:[#allocation3 + $0x50] sm:$0xff] (!%p2771_p13)  ;;  %v2374_v25 = vld [vmem:[#allocation3 + $0x58] sm:$0xff] (!%p2771_p13)  ;;  %v427_v27 = vld [vmem:[#allocation3 + $0x60] sm:$0xff] (!%p2771_p13) }
  0x97   : > { %v433_v10 = vadd.f32 (!%p2771_p13), %v432_v8, %v2350_v7  ;;  %v2378_v29 = vld [vmem:[#allocation3 + $0x68] sm:$0xff] (!%p2771_p13)  ;;  %v2380_v32 = vld [vmem:[#allocation3 + $0x70] sm:$0xff] (!%p2771_p13)  ;;  %v2383_v34 = vld [vmem:[#allocation3 + $0x78] sm:$0xff] (!%p2771_p13) }
  0x98   : > { %v1854_v31 = vld [vmem:[#allocation6 + $0x28] sm:$0xff] (!%p2771_p13)   ;;  %v1855_v38 = vld [vmem:[#allocation6 + $0x30] sm:$0xff] (!%p2771_p13)   ;;  %v1856_v43 = vld [vmem:[#allocation6 + $0x38] sm:$0xff] (!%p2771_p13)  }
  0x99   : > { %v434_v12 = vadd.f32 %v433_v10, %v2353_v9 }
  0x9b   : > { %1625 = vmatpush3.bf16.xpose.msra.mxu0 %v1850_v1  ;;  %1727 = vmatpush3.bf16.xpose.msra.mxu1 %v1850_v1  ;;  %v435_v15 = vadd.f32 %v434_v12, %v2356_v11 }
  0x9c   : > { %1626 = vmatprep.subr.bf16.mxu0 %v1851_v2  ;;  %1720 = vmatprep.subr.bf16.mxu1 %v1851_v2 }
  0x9d   : > { %v436_v17 = vadd.f32 %v435_v15, %v2359_v14 }
  0x9f   : > { %v437_v19 = vadd.f32 %v436_v17, %v2362_v16 }
  0xa1   : > { %v438_v21 = vadd.f32 %v437_v19, %v2365_v18 }
  0xa3   : > { %1627 = vmatpush3.bf16.xpose.msra.mxu0 %v1851_v2  ;;  %1728 = vmatpush3.bf16.xpose.msra.mxu1 %v1851_v2  ;;  %v439_v24 = vadd.f32 %v438_v21, %v2368_v20 }
  0xa4   : > { %1628 = vmatprep.subr.bf16.mxu0 %v1852_v13  ;;  %1721 = vmatprep.subr.bf16.mxu1 %v1852_v13 }
  0xa5   : > { %v440_v26 = vadd.f32 %v439_v24, %v2371_v23 }
  0xa7   : > { %v441_v28 = vadd.f32 %v440_v26, %v2374_v25 }
  0xa9   : > { %v442_v30 = vadd.f32 %v441_v28, %v427_v27 }
  0xab   : > { %1629 = vmatpush3.bf16.xpose.msra.mxu0 %v1852_v13  ;;  %1729 = vmatpush3.bf16.xpose.msra.mxu1 %v1852_v13  ;;  %v443_v33 = vadd.f32 %v442_v30, %v2378_v29 }
  0xac   : > { %1630 = vmatprep.subr.bf16.mxu0 %v1853_v22  ;;  %1722 = vmatprep.subr.bf16.mxu1 %v1853_v22 }
  0xad   : > { %v444_v35 = vadd.f32 %v443_v33, %v2380_v32 }
  0xaf   : > { %v445_v36 = vadd.f32 %v444_v35, %v2383_v34 }
  0xb1   : > { %v446_v37 = vrot.slane %v445_v36, 4 }
  0xb3   : > { %1631 = vmatpush3.bf16.xpose.msra.mxu0 %v1853_v22  ;;  %1730 = vmatpush3.bf16.xpose.msra.mxu1 %v1853_v22  ;;  %v447_v39 = vadd.f32 %v446_v37, %v445_v36 }
  0xb4   : > { %1632 = vmatprep.subr.bf16.mxu0 %v1854_v31  ;;  %1723 = vmatprep.subr.bf16.mxu1 %v1854_v31 }
  0xb5   : > { %v448_v40 = vrot.slane %v447_v39, 2 }
  0xb7   : > { %v449_v41 = vadd.f32 %v448_v40, %v447_v39 }
  0xb9   : > { %v450_v42 = vrot.slane %v449_v41, 1 }
  0xbb   : > { %1633 = vmatpush3.bf16.xpose.msra.mxu0 %v1854_v31  ;;  %1731 = vmatpush3.bf16.xpose.msra.mxu1 %v1854_v31  ;;  %v451_v44 = vadd.f32 %v450_v42, %v449_v41 }
  0xbc   : > { %1634 = vmatprep.subr.bf16.mxu0 %v1855_v38  ;;  %1724 = vmatprep.subr.bf16.mxu1 %v1855_v38 }
  0xbd   : > { %v453_v45 = vmul.f32 0.0078125, %v451_v44 }
  0xbf   : > { %v2388_v46 = vsub.f32 %v2342_v3, %v453_v45  ;;  %v2391_v47 = vsub.f32 %v2344_v4, %v453_v45  ;;  %v2394_v48 = vsub.f32 %v2346_v5, %v453_v45  ;;  %v2397_v49 = vsub.f32 %v2350_v7, %v453_v45 }
  0xc0   : > { %v458_v52 = vsub.f32 %v2353_v9, %v453_v45  ;;  %v459_v54 = vsub.f32 %v2356_v11, %v453_v45  ;;  %v2410_v57 = vsub.f32 %v2359_v14, %v453_v45  ;;  %v2413_v60 = vsub.f32 %v2362_v16, %v453_v45 }
  0xc1   : > { %v470_v50 = vmul.f32 %v2388_v46, %v2388_v46  ;;  %v471_v51 = vmul.f32 %v2391_v47, %v2391_v47  ;;  %v472_v53 = vmul.f32 %v2394_v48, %v2394_v48  ;;  %v473_v55 = vmul.f32 %v2397_v49, %v2397_v49 }
  0xc2   : > { %v474_v58 = vmul.f32 %v458_v52, %v458_v52  ;;  %v475_v61 = vmul.f32 %v459_v54, %v459_v54  ;;  %v462_v63 = vsub.f32 %v2365_v18, %v453_v45  ;;  %v476_v0 = vmul.f32 %v2410_v57, %v2410_v57 }
  0xc3   : > { %1635 = vmatpush3.bf16.xpose.msra.mxu0 %v1855_v38  ;;  %1732 = vmatpush3.bf16.xpose.msra.mxu1 %v1855_v38  ;;  %v486_v56 = vadd.f32 %v471_v51, %v470_v50  ;;  %v463_v2 = vsub.f32 %v2368_v20, %v453_v45  ;;  %v477_v3 = vmul.f32 %v2413_v60, %v2413_v60  ;;  %v511_v38 = vlaneseq }
  0xc4   : > { %1636 = vmatprep.subr.bf16.mxu0 %v1856_v43  ;;  %1725 = vmatprep.subr.bf16.mxu1 %v1856_v43  ;;  %v464_v5 = vsub.f32 %v2371_v23, %v453_v45  ;;  %v478_v6 = vmul.f32 %v462_v63, %v462_v63  ;;  %v465_v8 = vsub.f32 %v2374_v25, %v453_v45 }
  0xc5   : > { %v487_v59 = vadd.f32 %v486_v56, %v472_v53  ;;  %v479_v9 = vmul.f32 %v463_v2, %v463_v2  ;;  %v466_v11 = vsub.f32 %v427_v27, %v453_v45  ;;  %v467_v14 = vsub.f32 %v2378_v29, %v453_v45 }
  0xc6   : > { %v480_v12 = vmul.f32 %v464_v5, %v464_v5  ;;  %v481_v15 = vmul.f32 %v465_v8, %v465_v8  ;;  %v468_v17 = vsub.f32 %v2380_v32, %v453_v45  ;;  %v469_v20 = vsub.f32 %v2383_v34, %v453_v45  ;;  %v2431_v34 = vld [vmem:[%s2737_s5] sm:$0x3] }
  0xc7   : > { %v488_v62 = vadd.f32 %v487_v59, %v473_v55  ;;  %v482_v18 = vmul.f32 %v466_v11, %v466_v11  ;;  %v483_v21 = vmul.f32 %v467_v14, %v467_v14  ;;  %v2426_v39 = vshrl.u32 %v511_v38, 7 }
  0xc8   : > { %v484_v23 = vmul.f32 %v468_v17, %v468_v17  ;;  %v485_v25 = vmul.f32 %v469_v20, %v469_v20 }
  0xc9   : > { %v489_v1 = vadd.f32 %v488_v62, %v474_v58  ;;  %v513_v40 = vsub.s32 0, %v2426_v39 }
  0xcb   : > { %1637 = vmatpush3.bf16.xpose.msra.mxu0 %v1856_v43  ;;  %1733 = vmatpush3.bf16.xpose.msra.mxu1 %v1856_v43  ;;  %v490_v4 = vadd.f32 %v489_v1, %v475_v61 }
  0xcd   : > { %v491_v7 = vadd.f32 %v490_v4, %v476_v0 }
  0xcf   : > { %v492_v10 = vadd.f32 %v491_v7, %v477_v3 }
  0xd1   : > { %v493_v13 = vadd.f32 %v492_v10, %v478_v6 }
  0xd3   : > { %v494_v16 = vadd.f32 %v493_v13, %v479_v9 }
  0xd5   : > { %v495_v19 = vadd.f32 %v494_v16, %v480_v12 }
  0xd7   : > { %v496_v22 = vadd.f32 %v495_v19, %v481_v15 }
  0xd9   : > { %v497_v24 = vadd.f32 %v496_v22, %v482_v18 }
  0xdb   : > { %v498_v26 = vadd.f32 %v497_v24, %v483_v21 }
  0xdd   : > { %v499_v28 = vadd.f32 %v498_v26, %v484_v23 }
  0xdf   : > { %v500_v27 = vadd.f32 %v499_v28, %v485_v25 }
  0xe1   : > { %v501_v30 = vrot.slane %v500_v27, 4 }
  0xe3   : > { %v502_v31 = vadd.f32 %v501_v30, %v500_v27 }
  0xe5   : > { %v503_v33 = vrot.slane %v502_v31, 2 }
  0xe7   : > { %v504_v29 = vadd.f32 %v503_v33, %v502_v31 }
  0xe9   : > { %v505_v35 = vrot.slane %v504_v29, 1 }
  0xeb   : > { %v506_v36 = vadd.f32 %v505_v35, %v504_v29 }
  0xed   : > { %v507_v37 = vmul.f32 0.0078125, %v506_v36 }
  0xef   : > { %v508_v32 = vadd.f32 1e-05, %v507_v37 }
  0xf1   : > { %1857 = vrsqrt.f32 %v508_v32 }
  0xfb   : > { %v1858_v41 = vpop.eup %1857 }
  0xfc   : > { %v510_v42 = vmul.f32 %v1858_v41, %v2431_v34 }
  0xfe   : > { %v514_v43 = vrot.slane %v510_v42, %v513_v40 }
 0x100   : > { %v515_v44 = vmul.f32 %v514_v43, %v2388_v46  ;;  %v516_v45 = vmul.f32 %v514_v43, %v2391_v47  ;;  %v517_v50 = vmul.f32 %v514_v43, %v2394_v48  ;;  %v518_v51 = vmul.f32 %v514_v43, %v2397_v49 }
 0x101   : > { %v519_v53 = vmul.f32 %v514_v43, %v458_v52  ;;  %v520_v55 = vmul.f32 %v514_v43, %v459_v54  ;;  %v523_v59 = vmul.f32 %v514_v43, %v462_v63  ;;  %v524_v61 = vmul.f32 %v514_v43, %v463_v2 }
 0x102   : > { %v547_v56 = vpack.c.bf16 %v516_v45, %v515_v44  ;;  %v548_v58 = vpack.c.bf16 %v518_v51, %v517_v50  ;;  %v525_v0 = vmul.f32 %v514_v43, %v464_v5  ;;  %v526_v1 = vmul.f32 %v514_v43, %v465_v8 }
 0x103   : > { %v549_v62 = vpack.c.bf16 %v520_v55, %v519_v53  ;;  %v551_v3 = vpack.c.bf16 %v524_v61, %v523_v59  ;;  %v527_v4 = vmul.f32 %v514_v43, %v466_v11  ;;  %v528_v6 = vmul.f32 %v514_v43, %v467_v14 }
 0x104   : > { %1638 = vmatprep.mubr.bf16.mxu0 %v547_v56  ;;  %v521_v46 = vmul.f32 %v514_v43, %v2410_v57  ;;  %v522_v47 = vmul.f32 %v514_v43, %v2413_v60  ;;  %v552_v48 = vpack.c.bf16 %v526_v1, %v525_v0  ;;  %v529_v52 = vmul.f32 %v514_v43, %v468_v17 }
 0x105   : > { %1639 = vmatmul.mubr.bf16.vlgmr.msra.gmra.mrb[0].mxu0 %v548_v58  ;;  %1646 = vmatprep.mubr.bf16.mxu1 %v551_v3  ;;  %v553_v49 = vpack.c.bf16 %v528_v6, %v527_v4  ;;  %v530_v54 = vmul.f32 %v514_v43, %v469_v20 }
 0x106   : > { %1642 = vmatprep.mubr.bf16.mxu0 %v549_v62  ;;  %1647 = vmatmul.mubr.bf16.vlgmr.msra.gmra.mrb[0].mxu1 %v552_v48  ;;  %v550_v63 = vpack.c.bf16 %v522_v47, %v521_v46 }
 0x107   : > { %1650 = vmatprep.mubr.bf16.mxu1 %v553_v49  ;;  %v554_v2 = vpack.c.bf16 %v530_v54, %v529_v52 }
 0x10d   : > { %1643 = vmatmul.mubr.bf16.gmra.mrb[4].mxu0 %v550_v63 }
 0x10e   : > { %1651 = vmatmul.mubr.bf16.gmra.mrb[4].mxu1 %v554_v2 }
 0x1d8   : > { %v1640_v5 = vpop.f32.mrb[0].mxu0 }
 0x1d9   : > { %v637_v7 = vpop.f32.mrb[1].mxu0  ;;  %v1648_v9 = vpop.f32.mrb[0].mxu1 }
 0x1da   : > { %v1641_v8 = vpop.f32.mrb[2].mxu0  ;;  %v669_v57 = vpop.f32.mrb[1].mxu1 }
 0x1db   : > { %v640_v10 = vpop.f32.mrb[3].mxu0  ;;  %v1649_v60 = vpop.f32.mrb[2].mxu1 }
 0x1dc   : > { %v700_v11 = vadd.f32 %v640_v10, %v637_v7  ;;  %v672_v12 = vpop.f32.mrb[3].mxu1 }
 0x1de   : > { %v701_v13 = vadd.f32 %v1640_v5, %v700_v11 }
 0x1e0   : > { %v1644_v14 = vpop.f32.mrb[4].mxu0  ;;  %v702_v15 = vadd.f32 %v1641_v8, %v701_v13 }
 0x1e1   : > { %v653_v16 = vpop.f32.mrb[5].mxu0  ;;  %v1652_v19 = vpop.f32.mrb[4].mxu1 }
 0x1e2   : > { %v703_v17 = vadd.f32 %v702_v15, %v653_v16  ;;  %v1645_v18 = vpop.f32.mrb[6].mxu0  ;;  %v685_v21 = vpop.f32.mrb[5].mxu1 }
 0x1e3   : > { %v656_v20 = vpop.f32.mrb[7].mxu0  ;;  %v1653_v23 = vpop.f32.mrb[6].mxu1 }
 0x1e4   : > { %v704_v22 = vadd.f32 %v703_v17, %v656_v20  ;;  %v688_v24 = vpop.f32.mrb[7].mxu1 }
 0x1e6   : > { %v705_v25 = vadd.f32 %v1644_v14, %v704_v22 }
 0x1e8   : > { %v706_v26 = vadd.f32 %v1645_v18, %v705_v25 }
 0x1ea   : > { %v707_v28 = vadd.f32 %v706_v26, %v669_v57 }
 0x1ec   : > { %v708_v27 = vadd.f32 %v707_v28, %v672_v12 }
 0x1ee   : > { %v709_v30 = vadd.f32 %v1648_v9, %v708_v27 }
 0x1f0   : > { %v710_v31 = vadd.f32 %v1649_v60, %v709_v30 }
 0x1f2   : > { %v711_v33 = vadd.f32 %v710_v31, %v685_v21 }
 0x1f4   : > { %v712_v29 = vadd.f32 %v711_v33, %v688_v24 }
 0x1f6   : > { %v713_v35 = vadd.f32 %v1652_v19, %v712_v29 }
 0x1f8   : > { %v714_v36 = vadd.f32 %v1653_v23, %v713_v35 }
 0x1fa   : > { %v715_v37 = vrot.slane %v714_v36, 4 }
 0x1fc   : > { %v716_v32 = vadd.f32 %v715_v37, %v714_v36  ;;  %v781_v37 = vsub.s32 1, %v2426_v39 }
 0x1fe   : > { %v717_v38 = vrot.slane %v716_v32, 2 }
 0x200   : > { %v718_v40 = vadd.f32 %v717_v38, %v716_v32  ;;  %v414_v38 = vld [vmem:[%s2772_s22] sm:$0x3] }
 0x202   : > { %v719_v41 = vrot.slane %v718_v40, 1 }
 0x204   : > { %v720_v42 = vadd.f32 %v719_v41, %v718_v40 }
 0x206   : > { %v721_v43 = vmul.f32 0.0078125, %v720_v42  ;;  %v802_v42 = vrot.slane %v414_v38, %v781_v37 }
 0x208   : > { %v722_v44 = vsub.f32 %v637_v7, %v721_v43  ;;  %v723_v45 = vsub.f32 %v640_v10, %v721_v43  ;;  %v724_v50 = vsub.f32 %v1640_v5, %v721_v43  ;;  %v725_v51 = vsub.f32 %v1641_v8, %v721_v43 }
 0x209   : > { %v726_v53 = vsub.f32 %v653_v16, %v721_v43  ;;  %v727_v55 = vsub.f32 %v656_v20, %v721_v43  ;;  %v728_v56 = vsub.f32 %v1644_v14, %v721_v43  ;;  %v729_v58 = vsub.f32 %v1645_v18, %v721_v43 }
 0x20a   : > { %v730_v59 = vsub.f32 %v669_v57, %v721_v43  ;;  %v731_v61 = vsub.f32 %v672_v12, %v721_v43  ;;  %v732_v62 = vsub.f32 %v1648_v9, %v721_v43  ;;  %v733_v0 = vsub.f32 %v1649_v60, %v721_v43 }
 0x20b   : > { %v734_v1 = vsub.f32 %v685_v21, %v721_v43  ;;  %v735_v3 = vsub.f32 %v688_v24, %v721_v43  ;;  %v736_v4 = vsub.f32 %v1652_v19, %v721_v43  ;;  %v737_v6 = vsub.f32 %v1653_v23, %v721_v43 }
 0x20c   : > { %v738_v46 = vmul.f32 %v722_v44, %v722_v44  ;;  %v739_v47 = vmul.f32 %v723_v45, %v723_v45  ;;  %v740_v48 = vmul.f32 %v724_v50, %v724_v50  ;;  %v741_v52 = vmul.f32 %v725_v51, %v725_v51 }
 0x20d   : > { %v742_v63 = vmul.f32 %v726_v53, %v726_v53  ;;  %v743_v5 = vmul.f32 %v727_v55, %v727_v55  ;;  %v744_v8 = vmul.f32 %v728_v56, %v728_v56  ;;  %v745_v57 = vmul.f32 %v729_v58, %v729_v58 }
 0x20e   : > { %v754_v49 = vadd.f32 %v739_v47, %v738_v46  ;;  %v746_v9 = vmul.f32 %v730_v59, %v730_v59  ;;  %v747_v12 = vmul.f32 %v731_v61, %v731_v61  ;;  %v748_v14 = vmul.f32 %v732_v62, %v732_v62 }
 0x20f   : > { %v749_v16 = vmul.f32 %v733_v0, %v733_v0  ;;  %v750_v18 = vmul.f32 %v734_v1, %v734_v1  ;;  %v751_v20 = vmul.f32 %v735_v3, %v735_v3  ;;  %v752_v22 = vmul.f32 %v736_v4, %v736_v4 }
 0x210   : > { %v755_v54 = vadd.f32 %v754_v49, %v740_v48  ;;  %v753_v24 = vmul.f32 %v737_v6, %v737_v6 }
 0x212   : > { %v756_v2 = vadd.f32 %v755_v54, %v741_v52 }
 0x214   : > { %v757_v7 = vadd.f32 %v756_v2, %v742_v63 }
 0x216   : > { %v758_v10 = vadd.f32 %v757_v7, %v743_v5 }
 0x218   : > { %v759_v11 = vadd.f32 %v758_v10, %v744_v8 }
 0x21a   : > { %v760_v60 = vadd.f32 %v759_v11, %v745_v57 }
 0x21c   : > { %v761_v13 = vadd.f32 %v760_v60, %v746_v9 }
 0x21e   : > { %v762_v15 = vadd.f32 %v761_v13, %v747_v12 }
 0x220   : > { %v763_v17 = vadd.f32 %v762_v15, %v748_v14 }
 0x222   : > { %v764_v19 = vadd.f32 %v763_v17, %v749_v16 }
 0x224   : > { %v765_v21 = vadd.f32 %v764_v19, %v750_v18 }
 0x226   : > { %v766_v23 = vadd.f32 %v765_v21, %v751_v20 }
 0x228   : > { %v767_v25 = vadd.f32 %v766_v23, %v752_v22 }
 0x22a   : > { %v768_v26 = vadd.f32 %v767_v25, %v753_v24 }
 0x22c   : > { %v769_v28 = vrot.slane %v768_v26, 4 }
 0x22e   : > { %v770_v27 = vadd.f32 %v769_v28, %v768_v26 }
 0x230   : > { %v771_v30 = vrot.slane %v770_v27, 2 }
 0x232   : > { %v772_v31 = vadd.f32 %v771_v30, %v770_v27 }
 0x234   : > { %v773_v33 = vrot.slane %v772_v31, 1 }
 0x236   : > { %v774_v29 = vadd.f32 %v773_v33, %v772_v31 }
 0x238   : > { %v775_v35 = vmul.f32 0.0078125, %v774_v29 }
 0x23a   : > { %v776_v36 = vadd.f32 1e-05, %v775_v35 }
 0x23c   : > { %1859 = vrsqrt.f32 %v776_v36 }
 0x246   : > { %v1860_v32 = vpop.eup %1859 }
 0x247   : > { %v778_v40 = vmul.f32 %v1860_v32, %v2431_v34 }
 0x249   : > { %v782_v41 = vrot.slane %v778_v40, %v781_v37 }
 0x24b   : > { %v783_v43 = vmul.f32 %v782_v41, %v722_v44  ;;  %v784_v46 = vmul.f32 %v782_v41, %v723_v45  ;;  %v785_v47 = vmul.f32 %v782_v41, %v724_v50  ;;  %v786_v48 = vmul.f32 %v782_v41, %v725_v51 }
 0x24c   : > { %v787_v49 = vmul.f32 %v782_v41, %v726_v53  ;;  %v788_v52 = vmul.f32 %v782_v41, %v727_v55  ;;  %v789_v54 = vmul.f32 %v782_v41, %v728_v56  ;;  %v790_v63 = vmul.f32 %v782_v41, %v729_v58 }
 0x24d   : > { %v791_v2 = vmul.f32 %v782_v41, %v730_v59  ;;  %v792_v5 = vmul.f32 %v782_v41, %v731_v61  ;;  %v793_v39 = vmul.f32 %v782_v41, %v732_v62  ;;  %v794_v7 = vmul.f32 %v782_v41, %v733_v0 }
 0x24e   : > { %v795_v8 = vmul.f32 %v782_v41, %v734_v1  ;;  %v796_v10 = vmul.f32 %v782_v41, %v735_v3  ;;  %v797_v57 = vmul.f32 %v782_v41, %v736_v4  ;;  %v798_v11 = vmul.f32 %v782_v41, %v737_v6 }
 0x24f   : > { %v803_v9 = vadd.f32 %v802_v42, %v783_v43  ;;  %v804_v34 = vadd.f32 %v802_v42, %v784_v46  ;;  %v805_v60 = vadd.f32 %v802_v42, %v785_v47  ;;  %v806_v12 = vadd.f32 %v802_v42, %v786_v48 }
 0x250   : > { %v807_v44 = vadd.f32 %v802_v42, %v787_v49  ;;  %v808_v45 = vadd.f32 %v802_v42, %v788_v52  ;;  %v809_v50 = vadd.f32 %v802_v42, %v789_v54  ;;  %v810_v51 = vadd.f32 %v802_v42, %v790_v63 }
 0x251   : > { %v811_v53 = vadd.f32 %v802_v42, %v791_v2  ;;  %v812_v55 = vadd.f32 %v802_v42, %v792_v5  ;;  %v813_v56 = vadd.f32 %v802_v42, %v793_v39  ;;  %v814_v58 = vadd.f32 %v802_v42, %v794_v7 }
 0x252   : > { %v815_v59 = vadd.f32 %v802_v42, %v795_v8  ;;  %v816_v61 = vadd.f32 %v802_v42, %v796_v10  ;;  %v817_v62 = vadd.f32 %v802_v42, %v797_v57  ;;  %v818_v0 = vadd.f32 %v802_v42, %v798_v11 }
 0x253   : > { %v819_v1 = vmax.f32 %v803_v9, 0.0  ;;  %v820_v3 = vmax.f32 %v804_v34, 0.0  ;;  %v821_v4 = vmax.f32 %v805_v60, 0.0  ;;  %v822_v6 = vmax.f32 %v806_v12, 0.0 }
 0x254   : > { %v823_v13 = vmax.f32 %v807_v44, 0.0  ;;  %v824_v14 = vmax.f32 %v808_v45, 0.0  ;;  %v825_v15 = vmax.f32 %v809_v50, 0.0  ;;  %v826_v16 = vmax.f32 %v810_v51, 0.0 }
 0x255   : > { %v827_v17 = vmax.f32 %v811_v53, 0.0  ;;  %v828_v18 = vmax.f32 %v812_v55, 0.0  ;;  %v829_v19 = vmax.f32 %v813_v56, 0.0  ;;  %v830_v20 = vmax.f32 %v814_v58, 0.0  ;;  %835 = vst [vmem:[#allocation2] sm:$0xff] %v819_v1  ;;  %836 = vst [vmem:[#allocation2 + $0x8] sm:$0xff] %v820_v3 }
 0x256   : > { %837 = vst [vmem:[#allocation2 + $0x10] sm:$0xff] %v821_v4  ;;  %838 = vst [vmem:[#allocation2 + $0x18] sm:$0xff] %v822_v6  ;;  %v831_v21 = vmax.f32 %v815_v59, 0.0  ;;  %v832_v22 = vmax.f32 %v816_v61, 0.0  ;;  %v833_v23 = vmax.f32 %v817_v62, 0.0  ;;  %v834_v24 = vmax.f32 %v818_v0, 0.0 }
 0x257   : > { %839 = vst [vmem:[#allocation2 + $0x20] sm:$0xff] %v823_v13  ;;  %840 = vst [vmem:[#allocation2 + $0x28] sm:$0xff] %v824_v14 }
 0x258   : > { %841 = vst [vmem:[#allocation2 + $0x30] sm:$0xff] %v825_v15  ;;  %842 = vst [vmem:[#allocation2 + $0x38] sm:$0xff] %v826_v16 }
 0x259   : > { %843 = vst [vmem:[#allocation2 + $0x40] sm:$0xff] %v827_v17  ;;  %844 = vst [vmem:[#allocation2 + $0x48] sm:$0xff] %v828_v18 }
 0x25a   : > { %845 = vst [vmem:[#allocation2 + $0x50] sm:$0xff] %v829_v19  ;;  %846 = vst [vmem:[#allocation2 + $0x58] sm:$0xff] %v830_v20 }
 0x25b   : > { %847 = vst [vmem:[#allocation2 + $0x60] sm:$0xff] %v831_v21  ;;  %848 = vst [vmem:[#allocation2 + $0x68] sm:$0xff] %v832_v22 }
 0x25c   : > { %849 = vst [vmem:[#allocation2 + $0x70] sm:$0xff] %v833_v23  ;;  %850 = vst [vmem:[#allocation2 + $0x78] sm:$0xff] %v834_v24 }
 0x25d PF: > { %v1861_v25 = vld [vmem:[%s2318_s9] sm:$0xff]   ;;  %v1862_v26 = vld [vmem:[%s2318_s9 + $0x8] sm:$0xff]   ;;  %v1863_v28 = vld [vmem:[%s2318_s9 + $0x10] sm:$0xff]   ;;  %p1559_p2 = scmp.ne.s32.totalorder %s2151_s13, 1 }
 0x25e   : > { %1654 = vmatprep.subr.bf16.mxu0 %v1861_v25  ;;  %1734 = vmatprep.subr.bf16.mxu1 %v1861_v25  ;;  %v2449_v27 = vld [vmem:[#allocation2] sm:$0xff]  ;;  %v2451_v30 = vld [vmem:[#allocation2 + $0x8] sm:$0xff]  ;;  %v1864_v36 = vld [vmem:[%s2318_s9 + $0x18] sm:$0xff]   ;;  %s2773_s14 = sld [smem:[#allocation19_spill]] (!%p1559_p2) }
 0x25f   : > { %1655 = vmatpush3.bf16.xpose.msra.mxu0 %v1861_v25  ;;  %1742 = vmatpush3.bf16.xpose.msra.mxu1 %v1861_v25  ;;  %v883_v31 = vpack.c.bf16 %v2451_v30, %v2449_v27  ;;  %v1865_v37 = vld [vmem:[%s2318_s9 + $0x20] sm:$0xff]   ;;  %v1866_v32 = vld [vmem:[%s2318_s9 + $0x28] sm:$0xff]   ;;  %v1867_v38 = vld [vmem:[%s2318_s9 + $0x30] sm:$0xff]  }
 0x260   : > { %1656 = vmatprep.subr.bf16.mxu0 %v1862_v26  ;;  %1735 = vmatprep.subr.bf16.mxu1 %v1862_v26  ;;  %v2455_v33 = vld [vmem:[#allocation2 + $0x40] sm:$0xff]  ;;  %v2457_v29 = vld [vmem:[#allocation2 + $0x48] sm:$0xff]  ;;  %v1868_v40 = vld [vmem:[%s2318_s9 + $0x38] sm:$0xff]  }
 0x261   : > { %v887_v35 = vpack.c.bf16 %v2457_v29, %v2455_v33  ;;  %1670 = vmatprep.mubr.bf16.mxu0 %v883_v31  ;;  %v2466_v41 = vld [vmem:[#allocation2 + $0x10] sm:$0xff]  ;;  %v2468_v42 = vld [vmem:[#allocation2 + $0x18] sm:$0xff]  ;;  %v2470_v43 = vld [vmem:[#allocation2 + $0x20] sm:$0xff] }
 0x262   : > { %v2472_v46 = vld [vmem:[#allocation2 + $0x50] sm:$0xff]  ;;  %v2474_v47 = vld [vmem:[#allocation2 + $0x58] sm:$0xff]  ;;  %v2476_v48 = vld [vmem:[#allocation2 + $0x28] sm:$0xff]  ;;  %v884_v54 = vpack.c.bf16 %v2468_v42, %v2466_v41 }
 0x263   : > { %1678 = vmatprep.mubr.bf16.mxu1 %v887_v35  ;;  %v2478_v49 = vld [vmem:[#allocation2 + $0x60] sm:$0xff]  ;;  %v2480_v52 = vld [vmem:[#allocation2 + $0x68] sm:$0xff]  ;;  %v888_v63 = vpack.c.bf16 %v2474_v47, %v2472_v46  ;;  %v885_v2 = vpack.c.bf16 %v2476_v48, %v2470_v43  ;;  %v2490_v39 = vld [vmem:[#allocation2 + $0x30] sm:$0xff] }
 0x264   : > { %v889_v5 = vpack.c.bf16 %v2480_v52, %v2478_v49  ;;  %v2492_v7 = vld [vmem:[#allocation2 + $0x38] sm:$0xff]  ;;  %v2494_v8 = vld [vmem:[#allocation2 + $0x70] sm:$0xff] }
 0x265   : > { %v2496_v10 = vld [vmem:[#allocation2 + $0x78] sm:$0xff]  ;;  %v886_v57 = vpack.c.bf16 %v2492_v7, %v2490_v39 }
 0x266   : > { %v890_v11 = vpack.c.bf16 %v2496_v10, %v2494_v8 }
 0x267   : > { %1657 = vmatpush3.bf16.xpose.msra.mxu0 %v1862_v26  ;;  %1743 = vmatpush3.bf16.xpose.msra.mxu1 %v1862_v26 }
 0x268   : > { %1658 = vmatprep.subr.bf16.mxu0 %v1863_v28  ;;  %1736 = vmatprep.subr.bf16.mxu1 %v1863_v28 }
 0x26f   : > { %1659 = vmatpush3.bf16.xpose.msra.mxu0 %v1863_v28  ;;  %1744 = vmatpush3.bf16.xpose.msra.mxu1 %v1863_v28 }
 0x270   : > { %1660 = vmatprep.subr.bf16.mxu0 %v1864_v36  ;;  %1737 = vmatprep.subr.bf16.mxu1 %v1864_v36 }
 0x277   : > { %1661 = vmatpush3.bf16.xpose.msra.mxu0 %v1864_v36  ;;  %1745 = vmatpush3.bf16.xpose.msra.mxu1 %v1864_v36 }
 0x278   : > { %1662 = vmatprep.subr.bf16.mxu0 %v1865_v37  ;;  %1738 = vmatprep.subr.bf16.mxu1 %v1865_v37 }
 0x27f   : > { %1663 = vmatpush3.bf16.xpose.msra.mxu0 %v1865_v37  ;;  %1746 = vmatpush3.bf16.xpose.msra.mxu1 %v1865_v37 }
 0x280   : > { %1664 = vmatprep.subr.bf16.mxu0 %v1866_v32  ;;  %1739 = vmatprep.subr.bf16.mxu1 %v1866_v32 }
 0x287   : > { %1665 = vmatpush3.bf16.xpose.msra.mxu0 %v1866_v32  ;;  %1747 = vmatpush3.bf16.xpose.msra.mxu1 %v1866_v32 }
 0x288   : > { %1666 = vmatprep.subr.bf16.mxu0 %v1867_v38  ;;  %1740 = vmatprep.subr.bf16.mxu1 %v1867_v38 }
 0x28f   : > { %1667 = vmatpush3.bf16.xpose.msra.mxu0 %v1867_v38  ;;  %1748 = vmatpush3.bf16.xpose.msra.mxu1 %v1867_v38 }
 0x290   : > { %1668 = vmatprep.subr.bf16.mxu0 %v1868_v40  ;;  %1741 = vmatprep.subr.bf16.mxu1 %v1868_v40 }
 0x297   : > { %1669 = vmatpush3.bf16.xpose.msra.mxu0 %v1868_v40  ;;  %1749 = vmatpush3.bf16.xpose.msra.mxu1 %v1868_v40 }
 0x29e   : > { %1671 = vmatmul.mubr.bf16.vlgmr.msra.gmra.mrb[0].mxu0 %v884_v54  ;;  %1679 = vmatmul.mubr.bf16.vlgmr.msra.gmra.mrb[0].mxu1 %v888_v63 }
 0x29f   : > { %1674 = vmatprep.mubr.bf16.mxu0 %v885_v2  ;;  %1682 = vmatprep.mubr.bf16.mxu1 %v889_v5 }
 0x2a6   : > { %1675 = vmatmul.mubr.bf16.gmra.mrb[4].mxu0 %v886_v57  ;;  %1683 = vmatmul.mubr.bf16.gmra.mrb[4].mxu1 %v890_v11 }
 0x371   : > { %v1672_v9 = vpop.f32.mrb[0].mxu0  ;;  %v1680_v34 = vpop.f32.mrb[0].mxu1 }
 0x372   : > { %v973_v60 = vpop.f32.mrb[1].mxu0  ;;  %v1005_v12 = vpop.f32.mrb[1].mxu1 }
 0x373   : > { %v1673_v44 = vpop.f32.mrb[2].mxu0  ;;  %v1681_v45 = vpop.f32.mrb[2].mxu1 }
 0x374   : > { %v976_v50 = vpop.f32.mrb[3].mxu0  ;;  %v1008_v51 = vpop.f32.mrb[3].mxu1 }
 0x375   : > { %v1038_v53 = vadd.f32 %v976_v50, %v973_v60 }
 0x377   : > { %v1039_v55 = vadd.f32 %v1672_v9, %v1038_v53 }
 0x379   : > { %v1676_v56 = vpop.f32.mrb[4].mxu0  ;;  %v1040_v58 = vadd.f32 %v1673_v44, %v1039_v55  ;;  %v1684_v59 = vpop.f32.mrb[4].mxu1 }
 0x37a   : > { %v989_v61 = vpop.f32.mrb[5].mxu0  ;;  %v1021_v62 = vpop.f32.mrb[5].mxu1 }
 0x37b   : > { %v1041_v0 = vadd.f32 %v1040_v58, %v989_v61  ;;  %v1677_v1 = vpop.f32.mrb[6].mxu0  ;;  %v1685_v3 = vpop.f32.mrb[6].mxu1 }
 0x37c   : > { %v992_v4 = vpop.f32.mrb[7].mxu0  ;;  %v1024_v6 = vpop.f32.mrb[7].mxu1 }
 0x37d   : > { %v1042_v13 = vadd.f32 %v1041_v0, %v992_v4 }
 0x37f   : > { %v1043_v14 = vadd.f32 %v1676_v56, %v1042_v13 }
 0x381   : > { %v1044_v15 = vadd.f32 %v1677_v1, %v1043_v14 }
 0x383   : > { %v1045_v16 = vadd.f32 %v1044_v15, %v1005_v12 }
 0x385   : > { %v1046_v17 = vadd.f32 %v1045_v16, %v1008_v51 }
 0x387   : > { %v1047_v18 = vadd.f32 %v1680_v34, %v1046_v17 }
 0x389   : > { %v1048_v19 = vadd.f32 %v1681_v45, %v1047_v18 }
 0x38b   : > { %v1049_v20 = vadd.f32 %v1048_v19, %v1021_v62 }
 0x38d   : > { %v1050_v21 = vadd.f32 %v1049_v20, %v1024_v6 }
 0x38f   : > { %v1051_v22 = vadd.f32 %v1684_v59, %v1050_v21 }
 0x391   : > { %v1052_v23 = vadd.f32 %v1685_v3, %v1051_v22 }
 0x393   : > { %v1053_v24 = vrot.slane %v1052_v23, 4 }
 0x395   : > { %v1054_v25 = vadd.f32 %v1053_v24, %v1052_v23 }
 0x397   : > { %v1055_v26 = vrot.slane %v1054_v25, 2 }
 0x399   : > { %v1056_v28 = vadd.f32 %v1055_v26, %v1054_v25 }
 0x39b   : > { %v1057_v31 = vrot.slane %v1056_v28, 1 }
 0x39d   : > { %v1058_v35 = vadd.f32 %v1057_v31, %v1056_v28 }
 0x39f   : > { %v1060_v36 = vmul.f32 0.0078125, %v1058_v35 }
 0x3a1   : > { %v2502_v37 = vsub.f32 %v973_v60, %v1060_v36  ;;  %v2504_v32 = vsub.f32 %v976_v50, %v1060_v36  ;;  %v2506_v38 = vsub.f32 %v1672_v9, %v1060_v36  ;;  %v2508_v40 = vsub.f32 %v1673_v44, %v1060_v36 }
 0x3a2   : > { %v2510_v54 = vsub.f32 %v989_v61, %v1060_v36  ;;  %v2512_v63 = vsub.f32 %v992_v4, %v1060_v36  ;;  %v2514_v2 = vsub.f32 %v1676_v56, %v1060_v36  ;;  %v2516_v5 = vsub.f32 %v1677_v1, %v1060_v36 }
 0x3a3   : > { %v2518_v57 = vsub.f32 %v1005_v12, %v1060_v36  ;;  %v2520_v11 = vsub.f32 %v1008_v51, %v1060_v36  ;;  %v2522_v60 = vsub.f32 %v1680_v34, %v1060_v36  ;;  %v2524_v50 = vsub.f32 %v1681_v45, %v1060_v36 }
 0x3a4   : > { %v2526_v9 = vsub.f32 %v1021_v62, %v1060_v36  ;;  %v2528_v44 = vsub.f32 %v1024_v6, %v1060_v36  ;;  %v2530_v53 = vsub.f32 %v1684_v59, %v1060_v36  ;;  %v2532_v55 = vsub.f32 %v1685_v3, %v1060_v36 }
 0x3a5   : > { %v1077_v56 = vmul.f32 %v2502_v37, %v2502_v37  ;;  %v1078_v12 = vmul.f32 %v2504_v32, %v2504_v32  ;;  %v1079_v34 = vmul.f32 %v2506_v38, %v2506_v38  ;;  %v1080_v45 = vmul.f32 %v2508_v40, %v2508_v40 }
 0x3a6   : > { %v1081_v59 = vmul.f32 %v2510_v54, %v2510_v54  ;;  %v1082_v62 = vmul.f32 %v2512_v63, %v2512_v63  ;;  %v1083_v1 = vmul.f32 %v2514_v2, %v2514_v2  ;;  %v1084_v4 = vmul.f32 %v2516_v5, %v2516_v5 }
 0x3a7   : > { %v1093_v51 = vadd.f32 %v1078_v12, %v1077_v56  ;;  %v1085_v13 = vmul.f32 %v2518_v57, %v2518_v57  ;;  %v1086_v15 = vmul.f32 %v2520_v11, %v2520_v11  ;;  %v1087_v17 = vmul.f32 %v2522_v60, %v2522_v60 }
 0x3a8   : > { %v1088_v19 = vmul.f32 %v2524_v50, %v2524_v50  ;;  %v1089_v21 = vmul.f32 %v2526_v9, %v2526_v9  ;;  %v1090_v23 = vmul.f32 %v2528_v44, %v2528_v44  ;;  %v1091_v25 = vmul.f32 %v2530_v53, %v2530_v53 }
 0x3a9   : > { %v1094_v58 = vadd.f32 %v1093_v51, %v1079_v34  ;;  %v1092_v28 = vmul.f32 %v2532_v55, %v2532_v55 }
 0x3ab   : > { %v1095_v61 = vadd.f32 %v1094_v58, %v1080_v45 }
 0x3ad   : > { %v1096_v0 = vadd.f32 %v1095_v61, %v1081_v59  ;;  %v1119_v61 = vlaneseq }
 0x3af   : > { %v1097_v3 = vadd.f32 %v1096_v0, %v1082_v62  ;;  %v1120_v62 = vshrl.u32 %v1119_v61, 7  ;;  %v1036_v0 = vld [vmem:[%s404_s23] sm:$0x1] }
 0x3b1   : > { %v1098_v6 = vadd.f32 %v1097_v3, %v1083_v1  ;;  %v1121_v1 = vsub.s32 0, %v1120_v62 }
 0x3b3   : > { %v1099_v14 = vadd.f32 %v1098_v6, %v1084_v4 }
 0x3b5   : > { %v1100_v16 = vadd.f32 %v1099_v14, %v1085_v13 }
 0x3b7   : > { %v1101_v18 = vadd.f32 %v1100_v16, %v1086_v15 }
 0x3b9   : > { %v1102_v20 = vadd.f32 %v1101_v18, %v1087_v17  ;;  %v1558_v17 = vld [vmem:[%s407_s16] ss:$0 sm:$0xff] }
 0x3bb   : > { %v1103_v22 = vadd.f32 %v1102_v20, %v1088_v19 }
 0x3bd   : > { %v1104_v24 = vadd.f32 %v1103_v22, %v1089_v21 }
 0x3bf   : > { %v1105_v26 = vadd.f32 %v1104_v24, %v1090_v23 }
 0x3c1   : > { %v1106_v31 = vadd.f32 %v1105_v26, %v1091_v25 }
 0x3c3   : > { %v1107_v35 = vadd.f32 %v1106_v31, %v1092_v28 }
 0x3c5   : > { %v1108_v36 = vrot.slane %v1107_v35, 4 }
 0x3c7   : > { %v1109_v56 = vadd.f32 %v1108_v36, %v1107_v35 }
 0x3c9   : > { %v1110_v12 = vrot.slane %v1109_v56, 2 }
 0x3cb   : > { %v1111_v34 = vadd.f32 %v1110_v12, %v1109_v56 }
 0x3cd   : > { %v1112_v51 = vrot.slane %v1111_v34, 1 }
 0x3cf   : > { %v1113_v45 = vadd.f32 %v1112_v51, %v1111_v34 }
 0x3d1   : > { %v1114_v58 = vmul.f32 0.0078125, %v1113_v45 }
 0x3d3   : > { %v1115_v59 = vadd.f32 1e-05, %v1114_v58 }
 0x3d5   : > { %1869 = vrsqrt.f32 %v1115_v59 }
 0x3df   : > { %v1870_v3 = vpop.eup %1869 }
 0x3e0   : > { %v1117_v4 = vmul.f32 %v1870_v3, %v1036_v0 }
 0x3e2   : > { %v1122_v6 = vrot.slane %v1117_v4, %v1121_v1 }
 0x3e4   : > { %v1124_v13 = vmul.f32 %v1122_v6, %v2502_v37  ;;  %v1125_v14 = vmul.f32 %v1122_v6, %v2504_v32  ;;  %v1126_v15 = vmul.f32 %v1122_v6, %v2506_v38  ;;  %v1127_v16 = vmul.f32 %v1122_v6, %v2508_v40 }
 0x3e5   : > { %v1128_v18 = vmul.f32 %v1122_v6, %v2510_v54  ;;  %v1129_v19 = vmul.f32 %v1122_v6, %v2512_v63  ;;  %v1130_v20 = vmul.f32 %v1122_v6, %v2514_v2  ;;  %v1131_v21 = vmul.f32 %v1122_v6, %v2516_v5 }
 0x3e6   : > { %v1132_v37 = vmul.f32 %v1122_v6, %v2518_v57  ;;  %v1133_v32 = vmul.f32 %v1122_v6, %v2520_v11  ;;  %v1134_v38 = vmul.f32 %v1122_v6, %v2522_v60  ;;  %v1135_v40 = vmul.f32 %v1122_v6, %v2524_v50 }
 0x3e7   : > { %v1136_v22 = vmul.f32 %v1122_v6, %v2526_v9  ;;  %v1137_v23 = vmul.f32 %v1122_v6, %v2528_v44  ;;  %v1138_v54 = vmul.f32 %v1122_v6, %v2530_v53  ;;  %v1139_v63 = vmul.f32 %v1122_v6, %v2532_v55 }
 0x3e8   : > { %v1146_v24 = vadd.f32 %v1558_v17, %v1124_v13  ;;  %v1147_v2 = vadd.f32 %v1558_v17, %v1125_v14  ;;  %v1148_v25 = vadd.f32 %v1558_v17, %v1126_v15  ;;  %v1149_v5 = vadd.f32 %v1558_v17, %v1127_v16  ;;  %v1871_v14 = vld [vmem:[#allocation9] sm:$0xff] (!%p1559_p2)   ;;  %v1872_v15 = vld [vmem:[#allocation9 + $0x8] sm:$0xff] (!%p1559_p2)  }
 0x3e9   : > { %v1150_v26 = vadd.f32 %v1558_v17, %v1128_v18  ;;  %v1151_v57 = vadd.f32 %v1558_v17, %v1129_v19  ;;  %v1152_v28 = vadd.f32 %v1558_v17, %v1130_v20  ;;  %v1153_v11 = vadd.f32 %v1558_v17, %v1131_v21  ;;  %1686 = vmatprep.subr.bf16.mxu0 (!%p1559_p2), %v1871_v14  ;;  %v1873_v18 = vld [vmem:[#allocation9 + $0x10] sm:$0xff] (!%p1559_p2)   ;;  %v1874_v19 = vld [vmem:[#allocation9 + $0x18] sm:$0xff] (!%p1559_p2)   ;;  %v1875_v20 = vld [vmem:[#allocation9 + $0x20] sm:$0xff] (!%p1559_p2)  }
 0x3ea   : > { %v1154_v31 = vadd.f32 %v1558_v17, %v1132_v37  ;;  %v1155_v60 = vadd.f32 %v1558_v17, %v1133_v32  ;;  %v1156_v35 = vadd.f32 %v1558_v17, %v1134_v38  ;;  %v1157_v50 = vadd.f32 %v1558_v17, %v1135_v40  ;;  %1750 = vmatprep.subr.bf16.mxu1 (!%p1559_p2), %v1871_v14  ;;  %v1876_v21 = vld [vmem:[#allocation9 + $0x28] sm:$0xff] (!%p1559_p2)   ;;  %v1877_v37 = vld [vmem:[#allocation9 + $0x30] sm:$0xff] (!%p1559_p2)   ;;  %v1878_v32 = vld [vmem:[#allocation9 + $0x38] sm:$0xff] (!%p1559_p2)  }
 0x3eb   : > { %v1158_v36 = vadd.f32 %v1558_v17, %v1136_v22  ;;  %v1159_v9 = vadd.f32 %v1558_v17, %v1137_v23  ;;  %v1160_v56 = vadd.f32 %v1558_v17, %v1138_v54  ;;  %v1161_v44 = vadd.f32 %v1558_v17, %v1139_v63  ;;  %1687 = vmatpush3.bf16.xpose.msra.mxu0 (!%p1559_p2), %v1871_v14 }
 0x3ec   : > { %v1162_v53 = vadd.f32 %v1146_v24, %v2449_v27  ;;  %v1163_v55 = vadd.f32 %v1147_v2, %v2451_v30  ;;  %v2595_v12 = vadd.f32 %v1148_v25, %v2466_v41  ;;  %v2598_v34 = vadd.f32 %v1149_v5, %v2468_v42  ;;  %1758 = vmatpush3.bf16.xpose.msra.mxu1 (!%p1559_p2), %v1871_v14  ;;  %v1560_v24 = vld [vmem:[%s2773_s14] ss:$0 sm:$0xff] (!%p1559_p2) }
 0x3ed   : > { %v2601_v51 = vadd.f32 %v1150_v26, %v2470_v43  ;;  %v2604_v45 = vadd.f32 %v1151_v57, %v2476_v48  ;;  %v2607_v58 = vadd.f32 %v1152_v28, %v2490_v39  ;;  %v2610_v59 = vadd.f32 %v1153_v11, %v2492_v7  ;;  %1688 = vmatprep.subr.bf16.mxu0 (!%p1559_p2), %v1872_v15 }
 0x3ee   : > { %v1170_v27 = vadd.f32 %v1154_v31, %v2455_v33  ;;  %v1171_v30 = vadd.f32 %v1155_v60, %v2457_v29  ;;  %v2615_v41 = vadd.f32 %v1156_v35, %v2472_v46  ;;  %v2618_v42 = vadd.f32 %v1157_v50, %v2474_v47  ;;  %1751 = vmatprep.subr.bf16.mxu1 (!%p1559_p2), %v1872_v15 }
 0x3ef   : > { %v2621_v43 = vadd.f32 %v1158_v36, %v2478_v49  ;;  %v2624_v48 = vadd.f32 %v1159_v9, %v2480_v52  ;;  %v2627_v39 = vadd.f32 %v1160_v56, %v2494_v8  ;;  %v2630_v7 = vadd.f32 %v1161_v44, %v2496_v10 }
 0x3f0   : > { %v1178_v33 = vmax.f32 %v1162_v53, 0.0  ;;  %v1179_v29 = vmax.f32 %v1163_v55, 0.0  ;;  %v1180_v46 = vmax.f32 %v2595_v12, 0.0  ;;  %v1181_v61 = vmax.f32 %v2598_v34, 0.0 }
 0x3f1   : > { %v1182_v47 = vmax.f32 %v2601_v51, 0.0  ;;  %v1183_v49 = vmax.f32 %v2604_v45, 0.0  ;;  %v1184_v62 = vmax.f32 %v2607_v58, 0.0  ;;  %v1185_v52 = vmax.f32 %v2610_v59, 0.0 }
 0x3f2   : > { %v1186_v0 = vmax.f32 %v1170_v27, 0.0  ;;  %v1187_v8 = vmax.f32 %v1171_v30, 0.0  ;;  %v1188_v1 = vmax.f32 %v2615_v41, 0.0  ;;  %v1189_v10 = vmax.f32 %v2618_v42, 0.0  ;;  %1194 = vst [vmem:[#allocation2] sm:$0xff] %v1178_v33  ;;  %1195 = vst [vmem:[#allocation2 + $0x8] sm:$0xff] %v1179_v29 }
 0x3f3   : > { %1196 = vst [vmem:[#allocation2 + $0x10] sm:$0xff] %v1180_v46  ;;  %1197 = vst [vmem:[#allocation2 + $0x18] sm:$0xff] %v1181_v61  ;;  %v1190_v3 = vmax.f32 %v2621_v43, 0.0  ;;  %v1191_v4 = vmax.f32 %v2624_v48, 0.0  ;;  %v1192_v6 = vmax.f32 %v2627_v39, 0.0  ;;  %v1193_v13 = vmax.f32 %v2630_v7, 0.0  ;;  %1689 = vmatpush3.bf16.xpose.msra.mxu0 (!%p1559_p2), %v1872_v15 }
 0x3f4   : > { %1198 = vst [vmem:[#allocation2 + $0x20] sm:$0xff] %v1182_v47  ;;  %1199 = vst [vmem:[#allocation2 + $0x28] sm:$0xff] %v1183_v49  ;;  %1213 = sbr.rel (%p1559_p2) target bundleno = 1295 (0x50f), region = 80  ;;  %v1230_v16 = vpack.c.bf16 (!%p1559_p2), %v1179_v29, %v1178_v33  ;;  %v1234_v17 = vpack.c.bf16 (!%p1559_p2), %v1187_v8, %v1186_v0  ;;  %1759 = vmatpush3.bf16.xpose.msra.mxu1 (!%p1559_p2), %v1872_v15  ;;  %1690 = vmatprep.subr.bf16.mxu0 (!%p1559_p2), %v1873_v18 }
 0x3f5   : > { %1200 = vst [vmem:[#allocation2 + $0x30] sm:$0xff] %v1184_v62  ;;  %1201 = vst [vmem:[#allocation2 + $0x38] sm:$0xff] %v1185_v52  ;;  %1752 = vmatprep.subr.bf16.mxu1 (!%p1559_p2), %v1873_v18  ;;  %v1231_v38 = vpack.c.bf16 (!%p1559_p2), %v1181_v61, %v1180_v46  ;;  %v1235_v40 = vpack.c.bf16 (!%p1559_p2), %v1189_v10, %v1188_v1  ;;  %v1232_v22 = vpack.c.bf16 (!%p1559_p2), %v1183_v49, %v1182_v47 }
 0x3f6   : > { %1202 = vst [vmem:[#allocation2 + $0x40] sm:$0xff] %v1186_v0  ;;  %1203 = vst [vmem:[#allocation2 + $0x48] sm:$0xff] %v1187_v8  ;;  %1702 = vmatprep.mubr.bf16.mxu0 (!%p1559_p2), %v1230_v16  ;;  %1710 = vmatprep.mubr.bf16.mxu1 (!%p1559_p2), %v1234_v17  ;;  %v1236_v23 = vpack.c.bf16 (!%p1559_p2), %v1191_v4, %v1190_v3  ;;  %v1233_v54 = vpack.c.bf16 (!%p1559_p2), %v1185_v52, %v1184_v62 }
 0x3f7   : > { %1204 = vst [vmem:[#allocation2 + $0x50] sm:$0xff] %v1188_v1  ;;  %1205 = vst [vmem:[#allocation2 + $0x58] sm:$0xff] %v1189_v10  ;;  %v1237_v63 = vpack.c.bf16 (!%p1559_p2), %v1193_v13, %v1192_v6 }
 0x3f8   : > { %1206 = vst [vmem:[#allocation2 + $0x60] sm:$0xff] %v1190_v3  ;;  %1207 = vst [vmem:[#allocation2 + $0x68] sm:$0xff] %v1191_v4 }
 0x3f9   : > { %1208 = vst [vmem:[#allocation2 + $0x70] sm:$0xff] %v1192_v6  ;;  %1209 = vst [vmem:[#allocation2 + $0x78] sm:$0xff] %v1193_v13 }
 0x3fb   : > { %1691 = vmatpush3.bf16.xpose.msra.mxu0 %v1873_v18 }
 0x3fc   : > { %1760 = vmatpush3.bf16.xpose.msra.mxu1 %v1873_v18  ;;  %1692 = vmatprep.subr.bf16.mxu0 %v1874_v19 }
 0x3fd   : > { %1753 = vmatprep.subr.bf16.mxu1 %v1874_v19 }
 0x403   : > { %1693 = vmatpush3.bf16.xpose.msra.mxu0 %v1874_v19 }
 0x404   : > { %1761 = vmatpush3.bf16.xpose.msra.mxu1 %v1874_v19  ;;  %1694 = vmatprep.subr.bf16.mxu0 %v1875_v20 }
 0x405   : > { %1754 = vmatprep.subr.bf16.mxu1 %v1875_v20 }
 0x40b   : > { %1695 = vmatpush3.bf16.xpose.msra.mxu0 %v1875_v20 }
 0x40c   : > { %1762 = vmatpush3.bf16.xpose.msra.mxu1 %v1875_v20  ;;  %1696 = vmatprep.subr.bf16.mxu0 %v1876_v21 }
 0x40d   : > { %1755 = vmatprep.subr.bf16.mxu1 %v1876_v21 }
 0x413   : > { %1697 = vmatpush3.bf16.xpose.msra.mxu0 %v1876_v21 }
 0x414   : > { %1763 = vmatpush3.bf16.xpose.msra.mxu1 %v1876_v21  ;;  %1698 = vmatprep.subr.bf16.mxu0 %v1877_v37 }
 0x415   : > { %1756 = vmatprep.subr.bf16.mxu1 %v1877_v37 }
 0x41b   : > { %1699 = vmatpush3.bf16.xpose.msra.mxu0 %v1877_v37 }
 0x41c   : > { %1764 = vmatpush3.bf16.xpose.msra.mxu1 %v1877_v37  ;;  %1700 = vmatprep.subr.bf16.mxu0 %v1878_v32 }
 0x41d   : > { %1757 = vmatprep.subr.bf16.mxu1 %v1878_v32 }
 0x423   : > { %1701 = vmatpush3.bf16.xpose.msra.mxu0 %v1878_v32 }
 0x424   : > { %1765 = vmatpush3.bf16.xpose.msra.mxu1 %v1878_v32 }
 0x42a   : > { %1703 = vmatmul.mubr.bf16.vlgmr.msra.gmra.mrb[0].mxu0 %v1231_v38 }
 0x42b   : > { %1711 = vmatmul.mubr.bf16.vlgmr.msra.gmra.mrb[0].mxu1 %v1235_v40  ;;  %1706 = vmatprep.mubr.bf16.mxu0 %v1232_v22 }
 0x42c   : > { %1714 = vmatprep.mubr.bf16.mxu1 %v1236_v23 }
 0x432   : > { %1707 = vmatmul.mubr.bf16.gmra.mrb[4].mxu0 %v1233_v54 }
 0x433   : > { %1715 = vmatmul.mubr.bf16.gmra.mrb[4].mxu1 %v1237_v63 }
 0x4fd   : > { %v1704_v2 = vpop.f32.mrb[0].mxu0 }
 0x4fe   : > { %v1712_v25 = vpop.f32.mrb[0].mxu1  ;;  %v1336_v5 = vadd.f32 %v1704_v2, %v1560_v24  ;;  %v1327_v57 = vpop.f32.mrb[1].mxu0 }
 0x4ff   : > { %v1368_v26 = vadd.f32 %v1712_v25, %v1560_v24  ;;  %v1359_v28 = vpop.f32.mrb[1].mxu1  ;;  %v1328_v11 = vadd.f32 %v1560_v24, %v1327_v57  ;;  %v1705_v60 = vpop.f32.mrb[2].mxu0 }
 0x500   : > { %v1360_v31 = vadd.f32 %v1560_v24, %v1359_v28  ;;  %v1713_v35 = vpop.f32.mrb[2].mxu1  ;;  %v1392_v50 = vmax.f32 %v1336_v5, 0.0  ;;  %v1339_v9 = vadd.f32 %v1705_v60, %v1560_v24  ;;  %v1330_v44 = vpop.f32.mrb[3].mxu0 }
 0x501   : > { %v1400_v36 = vmax.f32 %v1368_v26, 0.0  ;;  %v1371_v56 = vadd.f32 %v1713_v35, %v1560_v24  ;;  %v1362_v53 = vpop.f32.mrb[3].mxu1  ;;  %v1390_v55 = vmax.f32 %v1328_v11, 0.0  ;;  %v1331_v34 = vadd.f32 %v1560_v24, %v1330_v44 }
 0x502   : > { %v1398_v12 = vmax.f32 %v1360_v31, 0.0  ;;  %v1363_v51 = vadd.f32 %v1560_v24, %v1362_v53  ;;  %1408 = vst [vmem:[#allocation10 + $0x10] sm:$0xff] %v1392_v50  ;;  %v1393_v45 = vmax.f32 %v1339_v9, 0.0 }
 0x503   : > { %1416 = vst [vmem:[#allocation10 + $0x50] sm:$0xff] %v1400_v36  ;;  %v1401_v58 = vmax.f32 %v1371_v56, 0.0  ;;  %1406 = vst [vmem:[#allocation10] sm:$0xff] %v1390_v55  ;;  %v1391_v59 = vmax.f32 %v1331_v34, 0.0 }
 0x504   : > { %1414 = vst [vmem:[#allocation10 + $0x40] sm:$0xff] %v1398_v12  ;;  %v1399_v27 = vmax.f32 %v1363_v51, 0.0  ;;  %1409 = vst [vmem:[#allocation10 + $0x18] sm:$0xff] %v1393_v45 }
 0x505   : > { %1417 = vst [vmem:[#allocation10 + $0x58] sm:$0xff] %v1401_v58  ;;  %1407 = vst [vmem:[#allocation10 + $0x8] sm:$0xff] %v1391_v59  ;;  %v1708_v30 = vpop.f32.mrb[4].mxu0 }
 0x506   : > { %1415 = vst [vmem:[#allocation10 + $0x48] sm:$0xff] %v1399_v27  ;;  %v1716_v41 = vpop.f32.mrb[4].mxu1  ;;  %v1352_v42 = vadd.f32 %v1708_v30, %v1560_v24  ;;  %v1343_v48 = vpop.f32.mrb[5].mxu0 }
 0x507   : > { %v1384_v43 = vadd.f32 %v1716_v41, %v1560_v24  ;;  %v1375_v39 = vpop.f32.mrb[5].mxu1  ;;  %v1344_v7 = vadd.f32 %v1560_v24, %v1343_v48  ;;  %v1709_v29 = vpop.f32.mrb[6].mxu0 }
 0x508   : > { %v1376_v33 = vadd.f32 %v1560_v24, %v1375_v39  ;;  %v1717_v46 = vpop.f32.mrb[6].mxu1  ;;  %v1396_v61 = vmax.f32 %v1352_v42, 0.0  ;;  %v1355_v49 = vadd.f32 %v1709_v29, %v1560_v24  ;;  %v1346_v52 = vpop.f32.mrb[7].mxu0 }
 0x509   : > { %v1404_v47 = vmax.f32 %v1384_v43, 0.0  ;;  %v1387_v62 = vadd.f32 %v1717_v46, %v1560_v24  ;;  %v1378_v0 = vpop.f32.mrb[7].mxu1  ;;  %v1394_v8 = vmax.f32 %v1344_v7, 0.0  ;;  %v1347_v10 = vadd.f32 %v1560_v24, %v1346_v52 }
 0x50a   : > { %v1402_v1 = vmax.f32 %v1376_v33, 0.0  ;;  %v1379_v3 = vadd.f32 %v1560_v24, %v1378_v0  ;;  %1412 = vst [vmem:[#allocation10 + $0x30] sm:$0xff] %v1396_v61  ;;  %v1397_v4 = vmax.f32 %v1355_v49, 0.0 }
 0x50b   : > { %1420 = vst [vmem:[#allocation10 + $0x70] sm:$0xff] %v1404_v47  ;;  %v1405_v6 = vmax.f32 %v1387_v62, 0.0  ;;  %1410 = vst [vmem:[#allocation10 + $0x20] sm:$0xff] %v1394_v8  ;;  %v1395_v13 = vmax.f32 %v1347_v10, 0.0 }
 0x50c   : > { %1418 = vst [vmem:[#allocation10 + $0x60] sm:$0xff] %v1402_v1  ;;  %v1403_v14 = vmax.f32 %v1379_v3, 0.0  ;;  %1413 = vst [vmem:[#allocation10 + $0x38] sm:$0xff] %v1397_v4 }
 0x50d   : > { %1421 = vst [vmem:[#allocation10 + $0x78] sm:$0xff] %v1405_v6  ;;  %1411 = vst [vmem:[#allocation10 + $0x28] sm:$0xff] %v1395_v13 }
 0x50e   : > { %1419 = vst [vmem:[#allocation10 + $0x68] sm:$0xff] %v1403_v14 }
 0x50f PF: > { %p1805_p8 = scmp.eq.s32.totalorder %s2151_s13, 1  ;;  %s2079_s4 = smov [#allocation10]  }
 0x510   : > { %s1428_s20 = sshll.u32 %s2079_s4, 4  ;;  %s1429_s20 = int_to_ptr.vmem [resolvable:$true] %s1428_s20 }
 0x511   : > { %s1993_s9 = scalar_lea.vmem %s1429_s20, 2048  ;;  %p2000_p9 = scmp.lt.s32.totalorder %s1429_s20, %s1429_s20 }
 0x512   : > { %p1994_p10 = scmp.ne.s32.totalorder %s1429_s20, %s1993_s9  ;;  %p2001_p1 = scmp.lt.s32.totalorder %s1993_s9, %s1993_s9 }
 0x514   : > { %p1995_p0 = pnand %p1994_p10, %p1805_p8  ;;  %p2002_p3 = por %p2001_p1, %p2000_p9 }
 0x516   : > { %p1996_p5 = pneg %p1995_p0 }
 0x518   : > { %p2003_p4 = pnand %p2002_p3, %p1996_p5 }
 0x51a   : > { %2006 = shalt.err (!%p2003_p4)
}
 0x51b   : > { %s2774_s28 = sld [smem:[#allocation21_spill]] }
 0x521   : > { %s2007_s23 = scalar_lea.hbm %s2774_s28, 2048 }
 0x522   : > { %p2008_p12 = scmp.ne.s32.totalorder %s2774_s28, %s2007_s23  ;;  %p2013_p11 = scmp.lt.u32.totalorder %s2007_s23, %s2774_s28 }
 0x524   : > { %p2009_p6 = pnand %p2008_p12, %p1805_p8 }
 0x526   : > { %p2010_p7 = pneg %p2009_p6 }
 0x528   : > { %p2015_p13 = pnand %p2013_p11, %p2010_p7 }
 0x52a   : > { %2018 = shalt.err (!%p2015_p13)
}
 0x52b   : > { %s2080_s12 = smov 128   ;;  %s2081_s26 = smov 8  }
 0x52c   : > { %1781 = dma.vmem_to_hbm [thread:$0]  (%p1805_p8), %s1429_s20, 2048, %s2774_s28, [#allocation5], %s2080_s12, %s2080_s12, %s2081_s26  }
 0x52d   : > { %2052 = dma.done.wait (%p1805_p8), [#allocation5], 2048  }
 0x52e   : > { %2054 = vsyncadd (%p1805_p8), [#allocation5], 4294965248 }
 0x52f PF: > { %s2775_s12 = sld [smem:[#allocation16_spill]]  ;;  %s2776_s29 = sld [smem:[#allocation17_spill]] }
 0x530   : > { %s2777_s30 = smov %s2061_s10  ;;  %s2778_s10 = smov %s2065_s11 }
 0x535   : > { %p19_p2 = scmp.ge.s32.totalorder %s2775_s12, 4   ;;  %s2779_s11 = smov %s2776_s29 }
 0x537   :  { %21 = sbr.rel (!%p19_p2) target bundleno = 9 (0x9), region = 118 }
 0x53e   :  { %1444 = vsyncpa [#allocation4], 1 }
 0x53f   :  { %1446 = vsyncpa [#allocation4 + $0x1], 1 }
 0x540   :  { %1447 = vsyncpa [#allocation7], 1 }
 0x541   :  { %1448 = vsyncpa [#allocation5], 1 }
 0x542   :  { %1450 = vsyncpa [#allocation5 + $0x1], 1 }

</bundles_post_ra>
